<compile_context>
chip_gen: v7x
topology: tpu7x:2x2x1
jax: 0.10.0
libtpu: 0.0.40
codegen_flags: <defaults>
</compile_context>

<pallas_src>
import numpy as np
import jax
import jax.numpy as jnp
from jax.experimental import pallas as pl
from jax.experimental.pallas import tpu as pltpu

LSTM_IN = 126
LSTM_IN_PAD = 128
HIDDEN = 128


def _round_up(n, m):
    return ((n + m - 1) // m) * m


def _pad2d(a, rows, cols):
    return jnp.pad(a, ((0, rows - a.shape[0]), (0, cols - a.shape[1])))


def _sigmoid(x):
    # tanh identity: one transcendental instead of exp + reciprocal.
    return 0.5 * (jnp.tanh(0.5 * x) + 1.0)


# ----------------------------------------------------------------------------
# Fused kernel: in-kernel LSTM input projection + recurrence + full MLP.
# ----------------------------------------------------------------------------
def make_fused_kernel(n_mid):
    def kernel(z_ref, fc1_ref, w_ih_ref, w_hh_ref, b_lstm_ref, w1h_ref, *rest):
        gx_ref = rest[-1]                  # VMEM scratch (T*TB, 4*HIDDEN) f32
        out_ref = rest[-2]
        mids = rest[:2 * n_mid]
        wf_ref = rest[2 * n_mid]
        bf_ref = rest[2 * n_mid + 1]

        T = z_ref.shape[0]
        TB = z_ref.shape[1]
        cdt = w_hh_ref.dtype               # bf16 matmul compute dtype

        # ---- LSTM input projection: all T steps in ONE MXU matmul ----------
        # (TB is a multiple of 16, so the bf16 reshape is layout-trivial.)
        z2d = z_ref[...].reshape(T * TB, z_ref.shape[2])
        gx_ref[...] = (jnp.dot(z2d, w_ih_ref[...],
                               preferred_element_type=jnp.float32)
                       + b_lstm_ref[...])

        w_hh = w_hh_ref[...]

        # ---- Recurrence: only h @ W_hh is on the serial dependence chain ----
        def step(t, carry):
            h, c = carry
            row0 = pl.multiple_of(t * TB, TB)
            gates = gx_ref[pl.ds(row0, TB), :] + jnp.dot(
                h.astype(cdt), w_hh, preferred_element_type=jnp.float32)
            i = _sigmoid(gates[:, 0 * HIDDEN:1 * HIDDEN])
            f = _sigmoid(gates[:, 1 * HIDDEN:2 * HIDDEN])
            g = jnp.tanh(gates[:, 2 * HIDDEN:3 * HIDDEN])
            o = _sigmoid(gates[:, 3 * HIDDEN:4 * HIDDEN])
            c = f * c + i * g
            h = o * jnp.tanh(c)
            return (h, c)

        h0 = jnp.zeros((TB, HIDDEN), jnp.float32)
        unroll = T if T <= 8 else 4
        h, _ = jax.lax.fori_loop(0, T, step, (h0, h0), unroll=unroll)

        # ---- First FC layer: add the h-part to the precomputed partial -----
        act = fc1_ref[...] + jnp.dot(h.astype(cdt), w1h_ref[...],
                                     preferred_element_type=jnp.float32)
        act = jnp.maximum(act, 0.0)

        # ---- Remaining hidden layers (Linear + ReLU) ------------------------
        for li in range(n_mid):
            w = mids[2 * li][...]
            b = mids[2 * li + 1][...]
            act = jnp.maximum(
                jnp.dot(act.astype(cdt), w,
                        preferred_element_type=jnp.float32) + b, 0.0)

        # ---- Final Linear -> lane-dense (TB,128) slab (col 0 is the value) --
        out_ref[...] = jnp.dot(act.astype(cdt), wf_ref[...],
                               preferred_element_type=jnp.float32) + bf_ref[...]

    return kernel


# ----------------------------------------------------------------------------
# Parameter construction (logical, f32) + padded/bf16 kernel parameters.
# ----------------------------------------------------------------------------
def init_params(key, state_shape, action_shape, mlp_layers):
    input_dim = int(np.prod(state_shape)) + HIDDEN + int(np.prod(action_shape))
    layer_dims = [input_dim] + list(mlp_layers) + [1]
    n_fc = len(layer_dims) - 1
    ks = jax.random.split(key, 4 + n_fc)

    sd = 1.0 / np.sqrt(HIDDEN)
    w_ih = jax.random.uniform(ks[0], (LSTM_IN, 4 * HIDDEN), jnp.float32, -sd, sd)
    w_hh = jax.random.uniform(ks[1], (HIDDEN, 4 * HIDDEN), jnp.float32, -sd, sd)
    b_ih = jax.random.uniform(ks[2], (1, 4 * HIDDEN), jnp.float32, -sd, sd)
    b_hh = jax.random.uniform(ks[3], (1, 4 * HIDDEN), jnp.float32, -sd, sd)
    b_lstm = b_ih + b_hh

    weights, biases = [], []
    for i in range(n_fc):
        bd = 1.0 / np.sqrt(layer_dims[i])
        kw, kb = jax.random.split(ks[4 + i])
        weights.append(jax.random.uniform(
            kw, (layer_dims[i], layer_dims[i + 1]), jnp.float32, -bd, bd))
        biases.append(jax.random.uniform(
            kb, (1, layer_dims[i + 1]), jnp.float32, -bd, bd))
    return dict(w_ih=w_ih, w_hh=w_hh, b_lstm=b_lstm,
                weights=weights, biases=biases)


def prepare_kernel_params(params, state_shape, action_shape,
                          compute_dtype=jnp.bfloat16):
    dx = int(np.prod(state_shape))
    da = int(np.prod(action_shape))

    w_ih = _pad2d(params["w_ih"], LSTM_IN_PAD, 4 * HIDDEN).astype(compute_dtype)
    w_hh = params["w_hh"].astype(compute_dtype)
    b_lstm = params["b_lstm"]                       # (1, 4*HIDDEN) f32

    weights, biases = params["weights"], params["biases"]
    W1, b1 = weights[0], biases[0]
    h1p = _round_up(W1.shape[1], 128)
    # Row-wise split of the first FC weight: [x | lstm_h | actions].
    w1x = _pad2d(W1[:dx], dx, h1p).astype(compute_dtype)            # wrapper
    w1h = _pad2d(W1[dx:dx + HIDDEN], HIDDEN, h1p).astype(compute_dtype)
    w1a = _pad2d(W1[dx + HIDDEN:], da, h1p).astype(compute_dtype)   # wrapper
    b1p = _pad2d(b1, 1, h1p)

    mid_w, mid_b = [], []
    prev_p = h1p
    for w, b in zip(weights[1:-1], biases[1:-1]):
        outp = _round_up(w.shape[1], 128)
        mid_w.append(_pad2d(w, prev_p, outp).astype(compute_dtype))
        mid_b.append(_pad2d(b, 1, outp))
        prev_p = outp
    wf = _pad2d(weights[-1], prev_p, 128).astype(compute_dtype)
    bf = _pad2d(biases[-1], 1, 128)

    return dict(w_ih=w_ih, w_hh=w_hh, b_lstm=b_lstm,
                w1x=w1x, w1h=w1h, w1a=w1a, b1=b1p,
                mid_w=mid_w, mid_b=mid_b, wf=wf, bf=bf,
                dx=dx, da=da, h1p=h1p, compute_dtype=compute_dtype)


def _choose_batch_tile(B, tb_max=128):
    """Batch tile: <=128 rows, multiple of 16, >=2 grid blocks when B > 16."""
    n_blocks = max(1, -(-B // tb_max))
    if n_blocks == 1 and B > 16:
        n_blocks = 2            # let v7x shard the batch across its 2 TCs
    tb = _round_up(-(-B // n_blocks), 16)
    return tb, n_blocks


# ----------------------------------------------------------------------------
# Forward: tiny XLA pre-work (z transpose/cast + first-FC partial) + one
# fused pallas_call doing the LSTM (projection + recurrence) and the MLP.
# ----------------------------------------------------------------------------
def dmcnet_forward(kparams, x, z, actions):
    cd = kparams["compute_dtype"]
    B = x.shape[0]
    T = z.shape[1]
    h1p = kparams["h1p"]

    TB, n_blocks = _choose_batch_tile(B)
    B_pad = TB * n_blocks

    # z: pad features 126->128 and batch, time-major, bf16 (minimal HBM bytes).
    z_p = jnp.pad(z, ((0, B_pad - B), (0, 0), (0, LSTM_IN_PAD - LSTM_IN)))
    z_tm = jnp.transpose(z_p, (1, 0, 2)).astype(cd)           # (T, B_pad, 128)

    # Recurrence-independent first-FC partial: x@W_x + a@W_a + b1 (XLA, tiny).
    x_flat = x.reshape(B, -1).astype(cd)
    a_flat = actions.reshape(B, -1).astype(cd)
    fc1_part = (jnp.dot(x_flat, kparams["w1x"],
                        preferred_element_type=jnp.float32)
                + jnp.dot(a_flat, kparams["w1a"],
                          preferred_element_type=jnp.float32)
                + kparams["b1"])
    fc1_part = jnp.pad(fc1_part, ((0, B_pad - B), (0, 0)))    # (B_pad, h1p) f32

    args = [z_tm, fc1_part,
            kparams["w_ih"], kparams["w_hh"], kparams["b_lstm"],
            kparams["w1h"]]
    for w, b in zip(kparams["mid_w"], kparams["mid_b"]):
        args += [w, b]
    args += [kparams["wf"], kparams["bf"]]
    n_mid = len(kparams["mid_w"])

    # Weights/biases: untiled whole-array VMEM refs (no pipeline double-buffer).
    vmem = pl.BlockSpec(memory_space=pltpu.MemorySpace.VMEM)
    if n_blocks == 1:
        # grid==1: pipelining buys nothing; avoid the second pipeline buffer.
        z_spec, fc1_spec, out_spec = vmem, vmem, vmem
        n_buf = 1
    else:
        z_spec = pl.BlockSpec((T, TB, LSTM_IN_PAD), lambda i: (0, i, 0))
        fc1_spec = pl.BlockSpec((TB, h1p), lambda i: (i, 0))
        out_spec = pl.BlockSpec((TB, 128), lambda i: (i, 0))
        n_buf = 2
    in_specs = [z_spec, fc1_spec] + [vmem] * (len(args) - 2)

    # Explicit VMEM budget so the kernel stays valid under v5e/v7x defaults.
    weight_bytes = sum(int(np.prod(a.shape)) * a.dtype.itemsize
                       for a in args[2:])
    block_bytes = (T * TB * LSTM_IN_PAD * 2        # z tile (bf16)
                   + TB * h1p * 4                  # fc1 partial tile (f32)
                   + TB * 128 * 4)                 # output tile (f32)
    scratch_bytes = T * TB * 4 * HIDDEN * 4        # gx scratch (f32)
    need = n_buf * block_bytes + weight_bytes + scratch_bytes
    vmem_limit = int(min(max(need + need // 2 + (2 << 20), 16 << 20), 64 << 20))

    out = pl.pallas_call(
        make_fused_kernel(n_mid),
        out_shape=jax.ShapeDtypeStruct((B_pad, 128), jnp.float32),
        grid_spec=pltpu.PrefetchScalarGridSpec(
            num_scalar_prefetch=0,
            grid=(n_blocks,),
            in_specs=in_specs,
            out_specs=out_spec,
            scratch_shapes=[pltpu.VMEM((T * TB, 4 * HIDDEN), jnp.float32)]),
        compiler_params=pltpu.CompilerParams(
            dimension_semantics=("parallel",),
            vmem_limit_bytes=vmem_limit),
    )(*args)

    return out[:B, 0]


# ----------------------------------------------------------------------------
# Pure-JAX reference (same math / compute dtype as the kernel path).
# ----------------------------------------------------------------------------
def dmcnet_reference(params, x, z, actions, compute_dtype=jnp.bfloat16):
    B, T, _ = z.shape
    cd = compute_dtype
    w_ih = params["w_ih"].astype(cd)
    w_hh = params["w_hh"].astype(cd)
    b_lstm = params["b_lstm"]

    def step(carry, x_t):
        h, c = carry
        gates = (jnp.dot(x_t.astype(cd), w_ih,
                         preferred_element_type=jnp.float32)
                 + jnp.dot(h.astype(cd), w_hh,
                           preferred_element_type=jnp.float32)
                 + b_lstm)
        i = _sigmoid(gates[:, 0 * HIDDEN:1 * HIDDEN])
        f = _sigmoid(gates[:, 1 * HIDDEN:2 * HIDDEN])
        g = jnp.tanh(gates[:, 2 * HIDDEN:3 * HIDDEN])
        o = _sigmoid(gates[:, 3 * HIDDEN:4 * HIDDEN])
        c = f * c + i * g
        h = o * jnp.tanh(c)
        return (h, c), None

    h0 = jnp.zeros((B, HIDDEN), jnp.float32)
    (h, _), _ = jax.lax.scan(step, (h0, h0), jnp.transpose(z, (1, 0, 2)))

    feat = jnp.concatenate(
        [x.reshape(B, -1), h, actions.reshape(B, -1)], axis=-1)
    n = len(params["weights"])
    act = feat
    for li, (w, b) in enumerate(zip(params["weights"], params["biases"])):
        act = jnp.dot(act.astype(cd), w.astype(cd),
                      preferred_element_type=jnp.float32) + b
        if li < n - 1:
            act = jnp.maximum(act, 0.0)
    return act.reshape(-1)


if __name__ == "__main__":
    # Small shapes consistent with the module's forward.
    B, T = 4, 8
    state_shape = (20,)
    action_shape = (8,)
    mlp_layers = [64, 64, 64]

    key = jax.random.PRNGKey(0)
    kp_key, kx, kz, ka = jax.random.split(key, 4)
    params = init_params(kp_key, state_shape, action_shape, mlp_layers)
    kparams = prepare_kernel_params(params, state_shape, action_shape)

    x = jax.random.normal(kx, (B,) + state_shape, jnp.float32)
    z = jax.random.normal(kz, (B, T, LSTM_IN), jnp.float32)
    actions = jax.random.normal(ka, (B,) + action_shape, jnp.float32)

    fwd = jax.jit(lambda x_, z_, a_: dmcnet_forward(kparams, x_, z_, a_))
    values = jax.block_until_ready(fwd(x, z, actions))
    ref = jax.block_until_ready(dmcnet_reference(params, x, z, actions))

    assert values.shape == (B,)
    np.testing.assert_allclose(np.asarray(values), np.asarray(ref),
                               rtol=2e-2, atol=2e-2)
    print("KERNEL_OK")
</pallas_src>

<mosaic_0001>
module attributes {stable_mosaic.version = 11 : i64} {
  func.func @kernel(%arg0: i32, %arg1: memref<8x16x128xbf16, #tpu.memory_space<vmem>>, %arg2: memref<16x128xf32, #tpu.memory_space<vmem>>, %arg3: memref<128x512xbf16, #tpu.memory_space<vmem>>, %arg4: memref<128x512xbf16, #tpu.memory_space<vmem>>, %arg5: memref<1x512xf32, #tpu.memory_space<vmem>>, %arg6: memref<128x128xbf16, #tpu.memory_space<vmem>>, %arg7: memref<128x128xbf16, #tpu.memory_space<vmem>>, %arg8: memref<1x128xf32, #tpu.memory_space<vmem>>, %arg9: memref<128x128xbf16, #tpu.memory_space<vmem>>, %arg10: memref<1x128xf32, #tpu.memory_space<vmem>>, %arg11: memref<128x128xbf16, #tpu.memory_space<vmem>>, %arg12: memref<1x128xf32, #tpu.memory_space<vmem>>, %arg13: memref<16x128xf32, #tpu.memory_space<vmem>>, %arg14: memref<128x512xf32, #tpu.memory_space<vmem>>) attributes {dimension_semantics = [#tpu.dimension_semantics<parallel>], iteration_bounds = array<i64: 1>, scalar_prefetch = 0 : i64, scratch_operands = 1 : i64, tpu.core_type = #tpu.core_type<tc>, window_params = [{pipeline_mode = #tpu.pipeline_mode<synchronous>, transform_indices = @transform_0, window_bounds = array<i64: 8, 16, 128>}, {pipeline_mode = #tpu.pipeline_mode<synchronous>, transform_indices = @transform_1, window_bounds = array<i64: 16, 128>}, {pipeline_mode = #tpu.pipeline_mode<synchronous>, transform_indices = @transform_2, window_bounds = array<i64: 128, 512>}, {pipeline_mode = #tpu.pipeline_mode<synchronous>, transform_indices = @transform_3, window_bounds = array<i64: 128, 512>}, {pipeline_mode = #tpu.pipeline_mode<synchronous>, transform_indices = @transform_4, window_bounds = array<i64: 1, 512>}, {pipeline_mode = #tpu.pipeline_mode<synchronous>, transform_indices = @transform_5, window_bounds = array<i64: 128, 128>}, {pipeline_mode = #tpu.pipeline_mode<synchronous>, transform_indices = @transform_6, window_bounds = array<i64: 128, 128>}, {pipeline_mode = #tpu.pipeline_mode<synchronous>, transform_indices = @transform_7, window_bounds = array<i64: 1, 128>}, {pipeline_mode = #tpu.pipeline_mode<synchronous>, transform_indices = @transform_8, window_bounds = array<i64: 128, 128>}, {pipeline_mode = #tpu.pipeline_mode<synchronous>, transform_indices = @transform_9, window_bounds = array<i64: 1, 128>}, {pipeline_mode = #tpu.pipeline_mode<synchronous>, transform_indices = @transform_10, window_bounds = array<i64: 128, 128>}, {pipeline_mode = #tpu.pipeline_mode<synchronous>, transform_indices = @transform_11, window_bounds = array<i64: 1, 128>}, {pipeline_mode = #tpu.pipeline_mode<synchronous>, transform_indices = @transform_12, window_bounds = array<i64: 16, 128>}]} {
    %c0 = arith.constant 0 : index
    %c0_0 = arith.constant 0 : index
    %c0_1 = arith.constant 0 : index
    %0 = vector.load %arg1[%c0, %c0_0, %c0_1] : memref<8x16x128xbf16, #tpu.memory_space<vmem>>, vector<8x16x128xbf16>
    %1 = vector.shape_cast %0 : vector<8x16x128xbf16> to vector<128x128xbf16>
    %c0_2 = arith.constant 0 : index
    %c0_3 = arith.constant 0 : index
    %2 = vector.load %arg3[%c0_2, %c0_3] : memref<128x512xbf16, #tpu.memory_space<vmem>>, vector<128x512xbf16>
    %cst = arith.constant dense<0.000000e+00> : vector<128x512xf32>
    %3 = tpu.matmul %1, %2, %cst {dimension_numbers = #tpu.dot_dimension_numbers<[1], [0], [0], [1], [0, 0, 1, 1], [], []>} : vector<128x128xbf16>, vector<128x512xbf16>, vector<128x512xf32> -> vector<128x512xf32>
    %c0_4 = arith.constant 0 : index
    %c0_5 = arith.constant 0 : index
    %4 = vector.load %arg5[%c0_4, %c0_5] : memref<1x512xf32, #tpu.memory_space<vmem>>, vector<1x512xf32>
    %5 = vector.broadcast %4 : vector<1x512xf32> to vector<128x512xf32>
    %6 = arith.addf %3, %5 : vector<128x512xf32>
    %c0_6 = arith.constant 0 : index
    %c0_7 = arith.constant 0 : index
    %7 = vector.load %arg14[%c0_6, %c0_7] : memref<128x512xf32, #tpu.memory_space<vmem>>, vector<128x512xf32>
    tpu.vector_store %arg14[%c0_6, %c0_7], %6 {strides = array<i32>} : memref<128x512xf32, #tpu.memory_space<vmem>>, vector<128x512xf32>,
    %c0_8 = arith.constant 0 : index
    %c0_9 = arith.constant 0 : index
    %8 = vector.load %arg4[%c0_8, %c0_9] : memref<128x512xbf16, #tpu.memory_space<vmem>>, vector<128x512xbf16>
    %cst_10 = arith.constant 0.000000e+00 : f32
    %9 = vector.broadcast %cst_10 : f32 to vector<16x128xf32>
    %c0_i32 = arith.constant 0 : i32
    %c16_i32 = arith.constant 16 : i32
    %10 = arith.muli %c0_i32, %c16_i32 : i32
    %11 = tpu.assume_multiple %10, 16 : i32
    %12 = arith.index_cast %11 : i32 to index
    %c0_11 = arith.constant 0 : index
    %13 = vector.load %arg14[%12, %c0_11] : memref<128x512xf32, #tpu.memory_space<vmem>>, vector<16x512xf32>
    %14 = arith.truncf %9 : vector<16x128xf32> to vector<16x128xbf16>
    %cst_12 = arith.constant dense<0.000000e+00> : vector<16x512xf32>
    %15 = tpu.matmul %14, %8, %cst_12 {dimension_numbers = #tpu.dot_dimension_numbers<[1], [0], [0], [1], [0, 0, 1, 1], [], []>} : vector<16x128xbf16>, vector<128x512xbf16>, vector<16x512xf32> -> vector<16x512xf32>
    %16 = arith.addf %13, %15 : vector<16x512xf32>
    %17 = vector.extract_strided_slice %16 {offsets = [0, 0], sizes = [16, 128], strides = [1, 1]} : vector<16x512xf32> to vector<16x128xf32>
    %cst_13 = arith.constant 5.000000e-01 : f32
    %18 = vector.broadcast %cst_13 : f32 to vector<16x128xf32>
    %19 = arith.mulf %18, %17 : vector<16x128xf32>
    %20 = math.tanh %19 : vector<16x128xf32>
    %cst_14 = arith.constant 1.000000e+00 : f32
    %21 = vector.broadcast %cst_14 : f32 to vector<16x128xf32>
    %22 = arith.addf %20, %21 : vector<16x128xf32>
    %cst_15 = arith.constant 5.000000e-01 : f32
    %23 = vector.broadcast %cst_15 : f32 to vector<16x128xf32>
    %24 = arith.mulf %23, %22 : vector<16x128xf32>
    %25 = vector.extract_strided_slice %16 {offsets = [0, 128], sizes = [16, 128], strides = [1, 1]} : vector<16x512xf32> to vector<16x128xf32>
    %cst_16 = arith.constant 5.000000e-01 : f32
    %26 = vector.broadcast %cst_16 : f32 to vector<16x128xf32>
    %27 = arith.mulf %26, %25 : vector<16x128xf32>
    %28 = math.tanh %27 : vector<16x128xf32>
    %cst_17 = arith.constant 1.000000e+00 : f32
    %29 = vector.broadcast %cst_17 : f32 to vector<16x128xf32>
    %30 = arith.addf %28, %29 : vector<16x128xf32>
    %cst_18 = arith.constant 5.000000e-01 : f32
    %31 = vector.broadcast %cst_18 : f32 to vector<16x128xf32>
    %32 = arith.mulf %31, %30 : vector<16x128xf32>
    %33 = vector.extract_strided_slice %16 {offsets = [0, 256], sizes = [16, 128], strides = [1, 1]} : vector<16x512xf32> to vector<16x128xf32>
    %34 = math.tanh %33 : vector<16x128xf32>
    %35 = vector.extract_strided_slice %16 {offsets = [0, 384], sizes = [16, 128], strides = [1, 1]} : vector<16x512xf32> to vector<16x128xf32>
    %cst_19 = arith.constant 5.000000e-01 : f32
    %36 = vector.broadcast %cst_19 : f32 to vector<16x128xf32>
    %37 = arith.mulf %36, %35 : vector<16x128xf32>
    %38 = math.tanh %37 : vector<16x128xf32>
    %cst_20 = arith.constant 1.000000e+00 : f32
    %39 = vector.broadcast %cst_20 : f32 to vector<16x128xf32>
    %40 = arith.addf %38, %39 : vector<16x128xf32>
    %cst_21 = arith.constant 5.000000e-01 : f32
    %41 = vector.broadcast %cst_21 : f32 to vector<16x128xf32>
    %42 = arith.mulf %41, %40 : vector<16x128xf32>
    %43 = arith.mulf %32, %9 : vector<16x128xf32>
    %44 = arith.mulf %24, %34 : vector<16x128xf32>
    %45 = arith.addf %43, %44 : vector<16x128xf32>
    %46 = math.tanh %45 : vector<16x128xf32>
    %47 = arith.mulf %42, %46 : vector<16x128xf32>
    %c1_i32 = arith.constant 1 : i32
    %c16_i32_22 = arith.constant 16 : i32
    %48 = arith.muli %c1_i32, %c16_i32_22 : i32
    %49 = tpu.assume_multiple %48, 16 : i32
    %50 = arith.index_cast %49 : i32 to index
    %c0_23 = arith.constant 0 : index
    %51 = vector.load %arg14[%50, %c0_23] : memref<128x512xf32, #tpu.memory_space<vmem>>, vector<16x512xf32>
    %52 = arith.truncf %47 : vector<16x128xf32> to vector<16x128xbf16>
    %cst_24 = arith.constant dense<0.000000e+00> : vector<16x512xf32>
    %53 = tpu.matmul %52, %8, %cst_24 {dimension_numbers = #tpu.dot_dimension_numbers<[1], [0], [0], [1], [0, 0, 1, 1], [], []>} : vector<16x128xbf16>, vector<128x512xbf16>, vector<16x512xf32> -> vector<16x512xf32>
    %54 = arith.addf %51, %53 : vector<16x512xf32>
    %55 = vector.extract_strided_slice %54 {offsets = [0, 0], sizes = [16, 128], strides = [1, 1]} : vector<16x512xf32> to vector<16x128xf32>
    %cst_25 = arith.constant 5.000000e-01 : f32
    %56 = vector.broadcast %cst_25 : f32 to vector<16x128xf32>
    %57 = arith.mulf %56, %55 : vector<16x128xf32>
    %58 = math.tanh %57 : vector<16x128xf32>
    %cst_26 = arith.constant 1.000000e+00 : f32
    %59 = vector.broadcast %cst_26 : f32 to vector<16x128xf32>
    %60 = arith.addf %58, %59 : vector<16x128xf32>
    %cst_27 = arith.constant 5.000000e-01 : f32
    %61 = vector.broadcast %cst_27 : f32 to vector<16x128xf32>
    %62 = arith.mulf %61, %60 : vector<16x128xf32>
    %63 = vector.extract_strided_slice %54 {offsets = [0, 128], sizes = [16, 128], strides = [1, 1]} : vector<16x512xf32> to vector<16x128xf32>
    %cst_28 = arith.constant 5.000000e-01 : f32
    %64 = vector.broadcast %cst_28 : f32 to vector<16x128xf32>
    %65 = arith.mulf %64, %63 : vector<16x128xf32>
    %66 = math.tanh %65 : vector<16x128xf32>
    %cst_29 = arith.constant 1.000000e+00 : f32
    %67 = vector.broadcast %cst_29 : f32 to vector<16x128xf32>
    %68 = arith.addf %66, %67 : vector<16x128xf32>
    %cst_30 = arith.constant 5.000000e-01 : f32
    %69 = vector.broadcast %cst_30 : f32 to vector<16x128xf32>
    %70 = arith.mulf %69, %68 : vector<16x128xf32>
    %71 = vector.extract_strided_slice %54 {offsets = [0, 256], sizes = [16, 128], strides = [1, 1]} : vector<16x512xf32> to vector<16x128xf32>
    %72 = math.tanh %71 : vector<16x128xf32>
    %73 = vector.extract_strided_slice %54 {offsets = [0, 384], sizes = [16, 128], strides = [1, 1]} : vector<16x512xf32> to vector<16x128xf32>
    %cst_31 = arith.constant 5.000000e-01 : f32
    %74 = vector.broadcast %cst_31 : f32 to vector<16x128xf32>
    %75 = arith.mulf %74, %73 : vector<16x128xf32>
    %76 = math.tanh %75 : vector<16x128xf32>
    %cst_32 = arith.constant 1.000000e+00 : f32
    %77 = vector.broadcast %cst_32 : f32 to vector<16x128xf32>
    %78 = arith.addf %76, %77 : vector<16x128xf32>
    %cst_33 = arith.constant 5.000000e-01 : f32
    %79 = vector.broadcast %cst_33 : f32 to vector<16x128xf32>
    %80 = arith.mulf %79, %78 : vector<16x128xf32>
    %81 = arith.mulf %70, %45 : vector<16x128xf32>
    %82 = arith.mulf %62, %72 : vector<16x128xf32>
    %83 = arith.addf %81, %82 : vector<16x128xf32>
    %84 = math.tanh %83 : vector<16x128xf32>
    %85 = arith.mulf %80, %84 : vector<16x128xf32>
    %c2_i32 = arith.constant 2 : i32
    %c16_i32_34 = arith.constant 16 : i32
    %86 = arith.muli %c2_i32, %c16_i32_34 : i32
    %87 = tpu.assume_multiple %86, 16 : i32
    %88 = arith.index_cast %87 : i32 to index
    %c0_35 = arith.constant 0 : index
    %89 = vector.load %arg14[%88, %c0_35] : memref<128x512xf32, #tpu.memory_space<vmem>>, vector<16x512xf32>
    %90 = arith.truncf %85 : vector<16x128xf32> to vector<16x128xbf16>
    %cst_36 = arith.constant dense<0.000000e+00> : vector<16x512xf32>
    %91 = tpu.matmul %90, %8, %cst_36 {dimension_numbers = #tpu.dot_dimension_numbers<[1], [0], [0], [1], [0, 0, 1, 1], [], []>} : vector<16x128xbf16>, vector<128x512xbf16>, vector<16x512xf32> -> vector<16x512xf32>
    %92 = arith.addf %89, %91 : vector<16x512xf32>
    %93 = vector.extract_strided_slice %92 {offsets = [0, 0], sizes = [16, 128], strides = [1, 1]} : vector<16x512xf32> to vector<16x128xf32>
    %cst_37 = arith.constant 5.000000e-01 : f32
    %94 = vector.broadcast %cst_37 : f32 to vector<16x128xf32>
    %95 = arith.mulf %94, %93 : vector<16x128xf32>
    %96 = math.tanh %95 : vector<16x128xf32>
    %cst_38 = arith.constant 1.000000e+00 : f32
    %97 = vector.broadcast %cst_38 : f32 to vector<16x128xf32>
    %98 = arith.addf %96, %97 : vector<16x128xf32>
    %cst_39 = arith.constant 5.000000e-01 : f32
    %99 = vector.broadcast %cst_39 : f32 to vector<16x128xf32>
    %100 = arith.mulf %99, %98 : vector<16x128xf32>
    %101 = vector.extract_strided_slice %92 {offsets = [0, 128], sizes = [16, 128], strides = [1, 1]} : vector<16x512xf32> to vector<16x128xf32>
    %cst_40 = arith.constant 5.000000e-01 : f32
    %102 = vector.broadcast %cst_40 : f32 to vector<16x128xf32>
    %103 = arith.mulf %102, %101 : vector<16x128xf32>
    %104 = math.tanh %103 : vector<16x128xf32>
    %cst_41 = arith.constant 1.000000e+00 : f32
    %105 = vector.broadcast %cst_41 : f32 to vector<16x128xf32>
    %106 = arith.addf %104, %105 : vector<16x128xf32>
    %cst_42 = arith.constant 5.000000e-01 : f32
    %107 = vector.broadcast %cst_42 : f32 to vector<16x128xf32>
    %108 = arith.mulf %107, %106 : vector<16x128xf32>
    %109 = vector.extract_strided_slice %92 {offsets = [0, 256], sizes = [16, 128], strides = [1, 1]} : vector<16x512xf32> to vector<16x128xf32>
    %110 = math.tanh %109 : vector<16x128xf32>
    %111 = vector.extract_strided_slice %92 {offsets = [0, 384], sizes = [16, 128], strides = [1, 1]} : vector<16x512xf32> to vector<16x128xf32>
    %cst_43 = arith.constant 5.000000e-01 : f32
    %112 = vector.broadcast %cst_43 : f32 to vector<16x128xf32>
    %113 = arith.mulf %112, %111 : vector<16x128xf32>
    %114 = math.tanh %113 : vector<16x128xf32>
    %cst_44 = arith.constant 1.000000e+00 : f32
    %115 = vector.broadcast %cst_44 : f32 to vector<16x128xf32>
    %116 = arith.addf %114, %115 : vector<16x128xf32>
    %cst_45 = arith.constant 5.000000e-01 : f32
    %117 = vector.broadcast %cst_45 : f32 to vector<16x128xf32>
    %118 = arith.mulf %117, %116 : vector<16x128xf32>
    %119 = arith.mulf %108, %83 : vector<16x128xf32>
    %120 = arith.mulf %100, %110 : vector<16x128xf32>
    %121 = arith.addf %119, %120 : vector<16x128xf32>
    %122 = math.tanh %121 : vector<16x128xf32>
    %123 = arith.mulf %118, %122 : vector<16x128xf32>
    %c3_i32 = arith.constant 3 : i32
    %c16_i32_46 = arith.constant 16 : i32
    %124 = arith.muli %c3_i32, %c16_i32_46 : i32
    %125 = tpu.assume_multiple %124, 16 : i32
    %126 = arith.index_cast %125 : i32 to index
    %c0_47 = arith.constant 0 : index
    %127 = vector.load %arg14[%126, %c0_47] : memref<128x512xf32, #tpu.memory_space<vmem>>, vector<16x512xf32>
    %128 = arith.truncf %123 : vector<16x128xf32> to vector<16x128xbf16>
    %cst_48 = arith.constant dense<0.000000e+00> : vector<16x512xf32>
    %129 = tpu.matmul %128, %8, %cst_48 {dimension_numbers = #tpu.dot_dimension_numbers<[1], [0], [0], [1], [0, 0, 1, 1], [], []>} : vector<16x128xbf16>, vector<128x512xbf16>, vector<16x512xf32> -> vector<16x512xf32>
    %130 = arith.addf %127, %129 : vector<16x512xf32>
    %131 = vector.extract_strided_slice %130 {offsets = [0, 0], sizes = [16, 128], strides = [1, 1]} : vector<16x512xf32> to vector<16x128xf32>
    %cst_49 = arith.constant 5.000000e-01 : f32
    %132 = vector.broadcast %cst_49 : f32 to vector<16x128xf32>
    %133 = arith.mulf %132, %131 : vector<16x128xf32>
    %134 = math.tanh %133 : vector<16x128xf32>
    %cst_50 = arith.constant 1.000000e+00 : f32
    %135 = vector.broadcast %cst_50 : f32 to vector<16x128xf32>
    %136 = arith.addf %134, %135 : vector<16x128xf32>
    %cst_51 = arith.constant 5.000000e-01 : f32
    %137 = vector.broadcast %cst_51 : f32 to vector<16x128xf32>
    %138 = arith.mulf %137, %136 : vector<16x128xf32>
    %139 = vector.extract_strided_slice %130 {offsets = [0, 128], sizes = [16, 128], strides = [1, 1]} : vector<16x512xf32> to vector<16x128xf32>
    %cst_52 = arith.constant 5.000000e-01 : f32
    %140 = vector.broadcast %cst_52 : f32 to vector<16x128xf32>
    %141 = arith.mulf %140, %139 : vector<16x128xf32>
    %142 = math.tanh %141 : vector<16x128xf32>
    %cst_53 = arith.constant 1.000000e+00 : f32
    %143 = vector.broadcast %cst_53 : f32 to vector<16x128xf32>
    %144 = arith.addf %142, %143 : vector<16x128xf32>
    %cst_54 = arith.constant 5.000000e-01 : f32
    %145 = vector.broadcast %cst_54 : f32 to vector<16x128xf32>
    %146 = arith.mulf %145, %144 : vector<16x128xf32>
    %147 = vector.extract_strided_slice %130 {offsets = [0, 256], sizes = [16, 128], strides = [1, 1]} : vector<16x512xf32> to vector<16x128xf32>
    %148 = math.tanh %147 : vector<16x128xf32>
    %149 = vector.extract_strided_slice %130 {offsets = [0, 384], sizes = [16, 128], strides = [1, 1]} : vector<16x512xf32> to vector<16x128xf32>
    %cst_55 = arith.constant 5.000000e-01 : f32
    %150 = vector.broadcast %cst_55 : f32 to vector<16x128xf32>
    %151 = arith.mulf %150, %149 : vector<16x128xf32>
    %152 = math.tanh %151 : vector<16x128xf32>
    %cst_56 = arith.constant 1.000000e+00 : f32
    %153 = vector.broadcast %cst_56 : f32 to vector<16x128xf32>
    %154 = arith.addf %152, %153 : vector<16x128xf32>
    %cst_57 = arith.constant 5.000000e-01 : f32
    %155 = vector.broadcast %cst_57 : f32 to vector<16x128xf32>
    %156 = arith.mulf %155, %154 : vector<16x128xf32>
    %157 = arith.mulf %146, %121 : vector<16x128xf32>
    %158 = arith.mulf %138, %148 : vector<16x128xf32>
    %159 = arith.addf %157, %158 : vector<16x128xf32>
    %160 = math.tanh %159 : vector<16x128xf32>
    %161 = arith.mulf %156, %160 : vector<16x128xf32>
    %c4_i32 = arith.constant 4 : i32
    %c16_i32_58 = arith.constant 16 : i32
    %162 = arith.muli %c4_i32, %c16_i32_58 : i32
    %163 = tpu.assume_multiple %162, 16 : i32
    %164 = arith.index_cast %163 : i32 to index
    %c0_59 = arith.constant 0 : index
    %165 = vector.load %arg14[%164, %c0_59] : memref<128x512xf32, #tpu.memory_space<vmem>>, vector<16x512xf32>
    %166 = arith.truncf %161 : vector<16x128xf32> to vector<16x128xbf16>
    %cst_60 = arith.constant dense<0.000000e+00> : vector<16x512xf32>
    %167 = tpu.matmul %166, %8, %cst_60 {dimension_numbers = #tpu.dot_dimension_numbers<[1], [0], [0], [1], [0, 0, 1, 1], [], []>} : vector<16x128xbf16>, vector<128x512xbf16>, vector<16x512xf32> -> vector<16x512xf32>
    %168 = arith.addf %165, %167 : vector<16x512xf32>
    %169 = vector.extract_strided_slice %168 {offsets = [0, 0], sizes = [16, 128], strides = [1, 1]} : vector<16x512xf32> to vector<16x128xf32>
    %cst_61 = arith.constant 5.000000e-01 : f32
    %170 = vector.broadcast %cst_61 : f32 to vector<16x128xf32>
    %171 = arith.mulf %170, %169 : vector<16x128xf32>
    %172 = math.tanh %171 : vector<16x128xf32>
    %cst_62 = arith.constant 1.000000e+00 : f32
    %173 = vector.broadcast %cst_62 : f32 to vector<16x128xf32>
    %174 = arith.addf %172, %173 : vector<16x128xf32>
    %cst_63 = arith.constant 5.000000e-01 : f32
    %175 = vector.broadcast %cst_63 : f32 to vector<16x128xf32>
    %176 = arith.mulf %175, %174 : vector<16x128xf32>
    %177 = vector.extract_strided_slice %168 {offsets = [0, 128], sizes = [16, 128], strides = [1, 1]} : vector<16x512xf32> to vector<16x128xf32>
    %cst_64 = arith.constant 5.000000e-01 : f32
    %178 = vector.broadcast %cst_64 : f32 to vector<16x128xf32>
    %179 = arith.mulf %178, %177 : vector<16x128xf32>
    %180 = math.tanh %179 : vector<16x128xf32>
    %cst_65 = arith.constant 1.000000e+00 : f32
    %181 = vector.broadcast %cst_65 : f32 to vector<16x128xf32>
    %182 = arith.addf %180, %181 : vector<16x128xf32>
    %cst_66 = arith.constant 5.000000e-01 : f32
    %183 = vector.broadcast %cst_66 : f32 to vector<16x128xf32>
    %184 = arith.mulf %183, %182 : vector<16x128xf32>
    %185 = vector.extract_strided_slice %168 {offsets = [0, 256], sizes = [16, 128], strides = [1, 1]} : vector<16x512xf32> to vector<16x128xf32>
    %186 = math.tanh %185 : vector<16x128xf32>
    %187 = vector.extract_strided_slice %168 {offsets = [0, 384], sizes = [16, 128], strides = [1, 1]} : vector<16x512xf32> to vector<16x128xf32>
    %cst_67 = arith.constant 5.000000e-01 : f32
    %188 = vector.broadcast %cst_67 : f32 to vector<16x128xf32>
    %189 = arith.mulf %188, %187 : vector<16x128xf32>
    %190 = math.tanh %189 : vector<16x128xf32>
    %cst_68 = arith.constant 1.000000e+00 : f32
    %191 = vector.broadcast %cst_68 : f32 to vector<16x128xf32>
    %192 = arith.addf %190, %191 : vector<16x128xf32>
    %cst_69 = arith.constant 5.000000e-01 : f32
    %193 = vector.broadcast %cst_69 : f32 to vector<16x128xf32>
    %194 = arith.mulf %193, %192 : vector<16x128xf32>
    %195 = arith.mulf %184, %159 : vector<16x128xf32>
    %196 = arith.mulf %176, %186 : vector<16x128xf32>
    %197 = arith.addf %195, %196 : vector<16x128xf32>
    %198 = math.tanh %197 : vector<16x128xf32>
    %199 = arith.mulf %194, %198 : vector<16x128xf32>
    %c5_i32 = arith.constant 5 : i32
    %c16_i32_70 = arith.constant 16 : i32
    %200 = arith.muli %c5_i32, %c16_i32_70 : i32
    %201 = tpu.assume_multiple %200, 16 : i32
    %202 = arith.index_cast %201 : i32 to index
    %c0_71 = arith.constant 0 : index
    %203 = vector.load %arg14[%202, %c0_71] : memref<128x512xf32, #tpu.memory_space<vmem>>, vector<16x512xf32>
    %204 = arith.truncf %199 : vector<16x128xf32> to vector<16x128xbf16>
    %cst_72 = arith.constant dense<0.000000e+00> : vector<16x512xf32>
    %205 = tpu.matmul %204, %8, %cst_72 {dimension_numbers = #tpu.dot_dimension_numbers<[1], [0], [0], [1], [0, 0, 1, 1], [], []>} : vector<16x128xbf16>, vector<128x512xbf16>, vector<16x512xf32> -> vector<16x512xf32>
    %206 = arith.addf %203, %205 : vector<16x512xf32>
    %207 = vector.extract_strided_slice %206 {offsets = [0, 0], sizes = [16, 128], strides = [1, 1]} : vector<16x512xf32> to vector<16x128xf32>
    %cst_73 = arith.constant 5.000000e-01 : f32
    %208 = vector.broadcast %cst_73 : f32 to vector<16x128xf32>
    %209 = arith.mulf %208, %207 : vector<16x128xf32>
    %210 = math.tanh %209 : vector<16x128xf32>
    %cst_74 = arith.constant 1.000000e+00 : f32
    %211 = vector.broadcast %cst_74 : f32 to vector<16x128xf32>
    %212 = arith.addf %210, %211 : vector<16x128xf32>
    %cst_75 = arith.constant 5.000000e-01 : f32
    %213 = vector.broadcast %cst_75 : f32 to vector<16x128xf32>
    %214 = arith.mulf %213, %212 : vector<16x128xf32>
    %215 = vector.extract_strided_slice %206 {offsets = [0, 128], sizes = [16, 128], strides = [1, 1]} : vector<16x512xf32> to vector<16x128xf32>
    %cst_76 = arith.constant 5.000000e-01 : f32
    %216 = vector.broadcast %cst_76 : f32 to vector<16x128xf32>
    %217 = arith.mulf %216, %215 : vector<16x128xf32>
    %218 = math.tanh %217 : vector<16x128xf32>
    %cst_77 = arith.constant 1.000000e+00 : f32
    %219 = vector.broadcast %cst_77 : f32 to vector<16x128xf32>
    %220 = arith.addf %218, %219 : vector<16x128xf32>
    %cst_78 = arith.constant 5.000000e-01 : f32
    %221 = vector.broadcast %cst_78 : f32 to vector<16x128xf32>
    %222 = arith.mulf %221, %220 : vector<16x128xf32>
    %223 = vector.extract_strided_slice %206 {offsets = [0, 256], sizes = [16, 128], strides = [1, 1]} : vector<16x512xf32> to vector<16x128xf32>
    %224 = math.tanh %223 : vector<16x128xf32>
    %225 = vector.extract_strided_slice %206 {offsets = [0, 384], sizes = [16, 128], strides = [1, 1]} : vector<16x512xf32> to vector<16x128xf32>
    %cst_79 = arith.constant 5.000000e-01 : f32
    %226 = vector.broadcast %cst_79 : f32 to vector<16x128xf32>
    %227 = arith.mulf %226, %225 : vector<16x128xf32>
    %228 = math.tanh %227 : vector<16x128xf32>
    %cst_80 = arith.constant 1.000000e+00 : f32
    %229 = vector.broadcast %cst_80 : f32 to vector<16x128xf32>
    %230 = arith.addf %228, %229 : vector<16x128xf32>
    %cst_81 = arith.constant 5.000000e-01 : f32
    %231 = vector.broadcast %cst_81 : f32 to vector<16x128xf32>
    %232 = arith.mulf %231, %230 : vector<16x128xf32>
    %233 = arith.mulf %222, %197 : vector<16x128xf32>
    %234 = arith.mulf %214, %224 : vector<16x128xf32>
    %235 = arith.addf %233, %234 : vector<16x128xf32>
    %236 = math.tanh %235 : vector<16x128xf32>
    %237 = arith.mulf %232, %236 : vector<16x128xf32>
    %c6_i32 = arith.constant 6 : i32
    %c16_i32_82 = arith.constant 16 : i32
    %238 = arith.muli %c6_i32, %c16_i32_82 : i32
    %239 = tpu.assume_multiple %238, 16 : i32
    %240 = arith.index_cast %239 : i32 to index
    %c0_83 = arith.constant 0 : index
    %241 = vector.load %arg14[%240, %c0_83] : memref<128x512xf32, #tpu.memory_space<vmem>>, vector<16x512xf32>
    %242 = arith.truncf %237 : vector<16x128xf32> to vector<16x128xbf16>
    %cst_84 = arith.constant dense<0.000000e+00> : vector<16x512xf32>
    %243 = tpu.matmul %242, %8, %cst_84 {dimension_numbers = #tpu.dot_dimension_numbers<[1], [0], [0], [1], [0, 0, 1, 1], [], []>} : vector<16x128xbf16>, vector<128x512xbf16>, vector<16x512xf32> -> vector<16x512xf32>
    %244 = arith.addf %241, %243 : vector<16x512xf32>
    %245 = vector.extract_strided_slice %244 {offsets = [0, 0], sizes = [16, 128], strides = [1, 1]} : vector<16x512xf32> to vector<16x128xf32>
    %cst_85 = arith.constant 5.000000e-01 : f32
    %246 = vector.broadcast %cst_85 : f32 to vector<16x128xf32>
    %247 = arith.mulf %246, %245 : vector<16x128xf32>
    %248 = math.tanh %247 : vector<16x128xf32>
    %cst_86 = arith.constant 1.000000e+00 : f32
    %249 = vector.broadcast %cst_86 : f32 to vector<16x128xf32>
    %250 = arith.addf %248, %249 : vector<16x128xf32>
    %cst_87 = arith.constant 5.000000e-01 : f32
    %251 = vector.broadcast %cst_87 : f32 to vector<16x128xf32>
    %252 = arith.mulf %251, %250 : vector<16x128xf32>
    %253 = vector.extract_strided_slice %244 {offsets = [0, 128], sizes = [16, 128], strides = [1, 1]} : vector<16x512xf32> to vector<16x128xf32>
    %cst_88 = arith.constant 5.000000e-01 : f32
    %254 = vector.broadcast %cst_88 : f32 to vector<16x128xf32>
    %255 = arith.mulf %254, %253 : vector<16x128xf32>
    %256 = math.tanh %255 : vector<16x128xf32>
    %cst_89 = arith.constant 1.000000e+00 : f32
    %257 = vector.broadcast %cst_89 : f32 to vector<16x128xf32>
    %258 = arith.addf %256, %257 : vector<16x128xf32>
    %cst_90 = arith.constant 5.000000e-01 : f32
    %259 = vector.broadcast %cst_90 : f32 to vector<16x128xf32>
    %260 = arith.mulf %259, %258 : vector<16x128xf32>
    %261 = vector.extract_strided_slice %244 {offsets = [0, 256], sizes = [16, 128], strides = [1, 1]} : vector<16x512xf32> to vector<16x128xf32>
    %262 = math.tanh %261 : vector<16x128xf32>
    %263 = vector.extract_strided_slice %244 {offsets = [0, 384], sizes = [16, 128], strides = [1, 1]} : vector<16x512xf32> to vector<16x128xf32>
    %cst_91 = arith.constant 5.000000e-01 : f32
    %264 = vector.broadcast %cst_91 : f32 to vector<16x128xf32>
    %265 = arith.mulf %264, %263 : vector<16x128xf32>
    %266 = math.tanh %265 : vector<16x128xf32>
    %cst_92 = arith.constant 1.000000e+00 : f32
    %267 = vector.broadcast %cst_92 : f32 to vector<16x128xf32>
    %268 = arith.addf %266, %267 : vector<16x128xf32>
    %cst_93 = arith.constant 5.000000e-01 : f32
    %269 = vector.broadcast %cst_93 : f32 to vector<16x128xf32>
    %270 = arith.mulf %269, %268 : vector<16x128xf32>
    %271 = arith.mulf %260, %235 : vector<16x128xf32>
    %272 = arith.mulf %252, %262 : vector<16x128xf32>
    %273 = arith.addf %271, %272 : vector<16x128xf32>
    %274 = math.tanh %273 : vector<16x128xf32>
    %275 = arith.mulf %270, %274 : vector<16x128xf32>
    %c7_i32 = arith.constant 7 : i32
    %c16_i32_94 = arith.constant 16 : i32
    %276 = arith.muli %c7_i32, %c16_i32_94 : i32
    %277 = tpu.assume_multiple %276, 16 : i32
    %278 = arith.index_cast %277 : i32 to index
    %c0_95 = arith.constant 0 : index
    %279 = vector.load %arg14[%278, %c0_95] : memref<128x512xf32, #tpu.memory_space<vmem>>, vector<16x512xf32>
    %280 = arith.truncf %275 : vector<16x128xf32> to vector<16x128xbf16>
    %cst_96 = arith.constant dense<0.000000e+00> : vector<16x512xf32>
    %281 = tpu.matmul %280, %8, %cst_96 {dimension_numbers = #tpu.dot_dimension_numbers<[1], [0], [0], [1], [0, 0, 1, 1], [], []>} : vector<16x128xbf16>, vector<128x512xbf16>, vector<16x512xf32> -> vector<16x512xf32>
    %282 = arith.addf %279, %281 : vector<16x512xf32>
    %283 = vector.extract_strided_slice %282 {offsets = [0, 0], sizes = [16, 128], strides = [1, 1]} : vector<16x512xf32> to vector<16x128xf32>
    %cst_97 = arith.constant 5.000000e-01 : f32
    %284 = vector.broadcast %cst_97 : f32 to vector<16x128xf32>
    %285 = arith.mulf %284, %283 : vector<16x128xf32>
    %286 = math.tanh %285 : vector<16x128xf32>
    %cst_98 = arith.constant 1.000000e+00 : f32
    %287 = vector.broadcast %cst_98 : f32 to vector<16x128xf32>
    %288 = arith.addf %286, %287 : vector<16x128xf32>
    %cst_99 = arith.constant 5.000000e-01 : f32
    %289 = vector.broadcast %cst_99 : f32 to vector<16x128xf32>
    %290 = arith.mulf %289, %288 : vector<16x128xf32>
    %291 = vector.extract_strided_slice %282 {offsets = [0, 128], sizes = [16, 128], strides = [1, 1]} : vector<16x512xf32> to vector<16x128xf32>
    %cst_100 = arith.constant 5.000000e-01 : f32
    %292 = vector.broadcast %cst_100 : f32 to vector<16x128xf32>
    %293 = arith.mulf %292, %291 : vector<16x128xf32>
    %294 = math.tanh %293 : vector<16x128xf32>
    %cst_101 = arith.constant 1.000000e+00 : f32
    %295 = vector.broadcast %cst_101 : f32 to vector<16x128xf32>
    %296 = arith.addf %294, %295 : vector<16x128xf32>
    %cst_102 = arith.constant 5.000000e-01 : f32
    %297 = vector.broadcast %cst_102 : f32 to vector<16x128xf32>
    %298 = arith.mulf %297, %296 : vector<16x128xf32>
    %299 = vector.extract_strided_slice %282 {offsets = [0, 256], sizes = [16, 128], strides = [1, 1]} : vector<16x512xf32> to vector<16x128xf32>
    %300 = math.tanh %299 : vector<16x128xf32>
    %301 = vector.extract_strided_slice %282 {offsets = [0, 384], sizes = [16, 128], strides = [1, 1]} : vector<16x512xf32> to vector<16x128xf32>
    %cst_103 = arith.constant 5.000000e-01 : f32
    %302 = vector.broadcast %cst_103 : f32 to vector<16x128xf32>
    %303 = arith.mulf %302, %301 : vector<16x128xf32>
    %304 = math.tanh %303 : vector<16x128xf32>
    %cst_104 = arith.constant 1.000000e+00 : f32
    %305 = vector.broadcast %cst_104 : f32 to vector<16x128xf32>
    %306 = arith.addf %304, %305 : vector<16x128xf32>
    %cst_105 = arith.constant 5.000000e-01 : f32
    %307 = vector.broadcast %cst_105 : f32 to vector<16x128xf32>
    %308 = arith.mulf %307, %306 : vector<16x128xf32>
    %309 = arith.mulf %298, %273 : vector<16x128xf32>
    %310 = arith.mulf %290, %300 : vector<16x128xf32>
    %311 = arith.addf %309, %310 : vector<16x128xf32>
    %312 = math.tanh %311 : vector<16x128xf32>
    %313 = arith.mulf %308, %312 : vector<16x128xf32>
    %c8_i32 = arith.constant 8 : i32
    %c0_106 = arith.constant 0 : index
    %c0_107 = arith.constant 0 : index
    %314 = vector.load %arg2[%c0_106, %c0_107] : memref<16x128xf32, #tpu.memory_space<vmem>>, vector<16x128xf32>
    %315 = arith.truncf %313 : vector<16x128xf32> to vector<16x128xbf16>
    %c0_108 = arith.constant 0 : index
    %c0_109 = arith.constant 0 : index
    %316 = vector.load %arg6[%c0_108, %c0_109] : memref<128x128xbf16, #tpu.memory_space<vmem>>, vector<128x128xbf16>
    %cst_110 = arith.constant dense<0.000000e+00> : vector<16x128xf32>
    %317 = tpu.matmul %315, %316, %cst_110 {dimension_numbers = #tpu.dot_dimension_numbers<[1], [0], [0], [1], [0, 0, 1, 1], [], []>} : vector<16x128xbf16>, vector<128x128xbf16>, vector<16x128xf32> -> vector<16x128xf32>
    %318 = arith.addf %314, %317 : vector<16x128xf32>
    %cst_111 = arith.constant 0.000000e+00 : f32
    %319 = vector.broadcast %cst_111 : f32 to vector<16x128xf32>
    %320 = arith.maximumf %318, %319 : vector<16x128xf32>
    %c0_112 = arith.constant 0 : index
    %c0_113 = arith.constant 0 : index
    %321 = vector.load %arg7[%c0_112, %c0_113] : memref<128x128xbf16, #tpu.memory_space<vmem>>, vector<128x128xbf16>
    %c0_114 = arith.constant 0 : index
    %c0_115 = arith.constant 0 : index
    %322 = vector.load %arg8[%c0_114, %c0_115] : memref<1x128xf32, #tpu.memory_space<vmem>>, vector<1x128xf32>
    %323 = arith.truncf %320 : vector<16x128xf32> to vector<16x128xbf16>
    %cst_116 = arith.constant dense<0.000000e+00> : vector<16x128xf32>
    %324 = tpu.matmul %323, %321, %cst_116 {dimension_numbers = #tpu.dot_dimension_numbers<[1], [0], [0], [1], [0, 0, 1, 1], [], []>} : vector<16x128xbf16>, vector<128x128xbf16>, vector<16x128xf32> -> vector<16x128xf32>
    %325 = vector.broadcast %322 : vector<1x128xf32> to vector<16x128xf32>
    %326 = arith.addf %324, %325 : vector<16x128xf32>
    %cst_117 = arith.constant 0.000000e+00 : f32
    %327 = vector.broadcast %cst_117 : f32 to vector<16x128xf32>
    %328 = arith.maximumf %326, %327 : vector<16x128xf32>
    %c0_118 = arith.constant 0 : index
    %c0_119 = arith.constant 0 : index
    %329 = vector.load %arg9[%c0_118, %c0_119] : memref<128x128xbf16, #tpu.memory_space<vmem>>, vector<128x128xbf16>
    %c0_120 = arith.constant 0 : index
    %c0_121 = arith.constant 0 : index
    %330 = vector.load %arg10[%c0_120, %c0_121] : memref<1x128xf32, #tpu.memory_space<vmem>>, vector<1x128xf32>
    %331 = arith.truncf %328 : vector<16x128xf32> to vector<16x128xbf16>
    %cst_122 = arith.constant dense<0.000000e+00> : vector<16x128xf32>
    %332 = tpu.matmul %331, %329, %cst_122 {dimension_numbers = #tpu.dot_dimension_numbers<[1], [0], [0], [1], [0, 0, 1, 1], [], []>} : vector<16x128xbf16>, vector<128x128xbf16>, vector<16x128xf32> -> vector<16x128xf32>
    %333 = vector.broadcast %330 : vector<1x128xf32> to vector<16x128xf32>
    %334 = arith.addf %332, %333 : vector<16x128xf32>
    %cst_123 = arith.constant 0.000000e+00 : f32
    %335 = vector.broadcast %cst_123 : f32 to vector<16x128xf32>
    %336 = arith.maximumf %334, %335 : vector<16x128xf32>
    %337 = arith.truncf %336 : vector<16x128xf32> to vector<16x128xbf16>
    %c0_124 = arith.constant 0 : index
    %c0_125 = arith.constant 0 : index
    %338 = vector.load %arg11[%c0_124, %c0_125] : memref<128x128xbf16, #tpu.memory_space<vmem>>, vector<128x128xbf16>
    %cst_126 = arith.constant dense<0.000000e+00> : vector<16x128xf32>
    %339 = tpu.matmul %337, %338, %cst_126 {dimension_numbers = #tpu.dot_dimension_numbers<[1], [0], [0], [1], [0, 0, 1, 1], [], []>} : vector<16x128xbf16>, vector<128x128xbf16>, vector<16x128xf32> -> vector<16x128xf32>
    %c0_127 = arith.constant 0 : index
    %c0_128 = arith.constant 0 : index
    %340 = vector.load %arg12[%c0_127, %c0_128] : memref<1x128xf32, #tpu.memory_space<vmem>>, vector<1x128xf32>
    %341 = vector.broadcast %340 : vector<1x128xf32> to vector<16x128xf32>
    %342 = arith.addf %339, %341 : vector<16x128xf32>
    %c0_129 = arith.constant 0 : index
    %c0_130 = arith.constant 0 : index
    %343 = vector.load %arg13[%c0_129, %c0_130] : memref<16x128xf32, #tpu.memory_space<vmem>>, vector<16x128xf32>
    tpu.vector_store %arg13[%c0_129, %c0_130], %342 {strides = array<i32>} : memref<16x128xf32, #tpu.memory_space<vmem>>, vector<16x128xf32>,
    return
  }
  func.func @transform_0(%arg0: i32) -> (i32, i32, i32) {
    %c0_i32 = arith.constant 0 : i32
    %c0_i32_0 = arith.constant 0 : i32
    %c0_i32_1 = arith.constant 0 : i32
    %c0_i32_2 = arith.constant 0 : i32
    return %c0_i32, %c0_i32_0, %c0_i32_1 : i32, i32, i32
  }
  func.func @transform_1(%arg0: i32) -> (i32, i32) {
    %c0_i32 = arith.constant 0 : i32
    %c0_i32_0 = arith.constant 0 : i32
    %c0_i32_1 = arith.constant 0 : i32
    return %c0_i32, %c0_i32_0 : i32, i32
  }
  func.func @transform_2(%arg0: i32) -> (i32, i32) {
    %c0_i32 = arith.constant 0 : i32
    %c0_i32_0 = arith.constant 0 : i32
    %c0_i32_1 = arith.constant 0 : i32
    return %c0_i32, %c0_i32_0 : i32, i32
  }
  func.func @transform_3(%arg0: i32) -> (i32, i32) {
    %c0_i32 = arith.constant 0 : i32
    %c0_i32_0 = arith.constant 0 : i32
    %c0_i32_1 = arith.constant 0 : i32
    return %c0_i32, %c0_i32_0 : i32, i32
  }
  func.func @transform_4(%arg0: i32) -> (i32, i32) {
    %c0_i32 = arith.constant 0 : i32
    %c0_i32_0 = arith.constant 0 : i32
    %c0_i32_1 = arith.constant 0 : i32
    return %c0_i32, %c0_i32_0 : i32, i32
  }
  func.func @transform_5(%arg0: i32) -> (i32, i32) {
    %c0_i32 = arith.constant 0 : i32
    %c0_i32_0 = arith.constant 0 : i32
    %c0_i32_1 = arith.constant 0 : i32
    return %c0_i32, %c0_i32_0 : i32, i32
  }
  func.func @transform_6(%arg0: i32) -> (i32, i32) {
    %c0_i32 = arith.constant 0 : i32
    %c0_i32_0 = arith.constant 0 : i32
    %c0_i32_1 = arith.constant 0 : i32
    return %c0_i32, %c0_i32_0 : i32, i32
  }
  func.func @transform_7(%arg0: i32) -> (i32, i32) {
    %c0_i32 = arith.constant 0 : i32
    %c0_i32_0 = arith.constant 0 : i32
    %c0_i32_1 = arith.constant 0 : i32
    return %c0_i32, %c0_i32_0 : i32, i32
  }
  func.func @transform_8(%arg0: i32) -> (i32, i32) {
    %c0_i32 = arith.constant 0 : i32
    %c0_i32_0 = arith.constant 0 : i32
    %c0_i32_1 = arith.constant 0 : i32
    return %c0_i32, %c0_i32_0 : i32, i32
  }
  func.func @transform_9(%arg0: i32) -> (i32, i32) {
    %c0_i32 = arith.constant 0 : i32
    %c0_i32_0 = arith.constant 0 : i32
    %c0_i32_1 = arith.constant 0 : i32
    return %c0_i32, %c0_i32_0 : i32, i32
  }
  func.func @transform_10(%arg0: i32) -> (i32, i32) {
    %c0_i32 = arith.constant 0 : i32
    %c0_i32_0 = arith.constant 0 : i32
    %c0_i32_1 = arith.constant 0 : i32
    return %c0_i32, %c0_i32_0 : i32, i32
  }
  func.func @transform_11(%arg0: i32) -> (i32, i32) {
    %c0_i32 = arith.constant 0 : i32
    %c0_i32_0 = arith.constant 0 : i32
    %c0_i32_1 = arith.constant 0 : i32
    return %c0_i32, %c0_i32_0 : i32, i32
  }
  func.func @transform_12(%arg0: i32) -> (i32, i32) {
    %c0_i32 = arith.constant 0 : i32
    %c0_i32_0 = arith.constant 0 : i32
    %c0_i32_1 = arith.constant 0 : i32
    return %c0_i32, %c0_i32_0 : i32, i32
  }
}

</mosaic_0001>

<bundles_post_ra>
// kernel: _lambda_.1
= control target key start
LH: loop header
LB: loop body
LE: loop exit
PB: predicated region body
PF: predicated region fallthrough
CT: control target
= control target key end

     0   :  { %v3087_v1 = vmov 0   ;;  %vm3089_vm0 = vmmov 0   ;;  %s4173_s2 = inlined_call_operand.vmem [shape: bf16[128,512], index: 2, kind: input, shape index: {}]   ;;  %s4174_s0 = inlined_call_operand.vmem [shape: bf16[8,16,128], index: 0, kind: input, shape index: {}]   ;;  %s4175_s3 = inlined_call_operand.vmem [shape: bf16[128,512], index: 3, kind: input, shape index: {}]   ;;  %s4176_s4 = inlined_call_operand.vmem [shape: f32[1,512], index: 4, kind: input, shape index: {}]   ;;  %s4177_s5 = inlined_call_operand.vmem [shape: bf16[128,128], index: 5, kind: input, shape index: {}]   ;;  %s4178_s6 = inlined_call_operand.vmem [shape: bf16[128,128], index: 6, kind: input, shape index: {}]   ;;  %s4179_s8 = inlined_call_operand.vmem [shape: bf16[128,128], index: 8, kind: input, shape index: {}]   ;;  %s4180_s1 = inlined_call_operand.vmem [shape: f32[16,128], index: 1, kind: input, shape index: {}]   ;;  %s4181_s10 = inlined_call_operand.vmem [shape: bf16[128,128], index: 10, kind: input, shape index: {}]   ;;  %s4182_s7 = inlined_call_operand.vmem [shape: f32[1,128], index: 7, kind: input, shape index: {}]   ;;  %s4183_s9 = inlined_call_operand.vmem [shape: f32[1,128], index: 9, kind: input, shape index: {}]   ;;  %s4184_s11 = inlined_call_operand.vmem [shape: f32[1,128], index: 11, kind: input, shape index: {}]   ;;  %s4185_s12 = inlined_call_operand.vmem [shape: f32[16,128], index: 12, kind: output, shape index: {}]  }
   0x1   :  { %v2759_v0 = vld [vmem:[%s4173_s2 + $0x4] ss:$16 sps:$4 sm:$0xff]   ;;  %352 = vmatprep.mubr.bf16.mxu0 %v3087_v1  ;;  %465 = vmatprep.mubr.bf16.mxu1 %v3087_v1  ;;  %v2761_v2 = vld [vmem:[%s4173_s2 + $0xc] ss:$16 sps:$4 sm:$0xff]   ;;  %v2763_v3 = vld [vmem:[%s4173_s2] ss:$16 sps:$4 sm:$0xff]  }
   0x2   :  { %320 = vmatprep.subr.bf16.mxu0 %v2759_v0  ;;  %v2764_v4 = vld [vmem:[%s4173_s2 + $0x8] ss:$16 sps:$4 sm:$0xff]   ;;  %433 = vmatprep.subr.bf16.mxu1 %v2761_v2  ;;  %v2765_v5 = vld [vmem:[%s4173_s2 + $0x24] ss:$16 sps:$4 sm:$0xff]   ;;  %v2767_v6 = vld [vmem:[%s4173_s2 + $0x2c] ss:$16 sps:$4 sm:$0xff]  }
   0x3   :  { %321 = vmatpush1.bf16.msra.mxu0 %v2763_v3  ;;  %434 = vmatpush1.bf16.msra.mxu1 %v2764_v4  ;;  %v2769_v7 = vld [vmem:[%s4173_s2 + $0x20] ss:$16 sps:$4 sm:$0xff]   ;;  %v2770_v8 = vld [vmem:[%s4173_s2 + $0x28] ss:$16 sps:$4 sm:$0xff]   ;;  %v2771_v9 = vld [vmem:[%s4173_s2 + $0x44] ss:$16 sps:$4 sm:$0xff]  }
   0x4   :  { %322 = vmatprep.subr.bf16.mxu0 %v2765_v5  ;;  %435 = vmatprep.subr.bf16.mxu1 %v2767_v6  ;;  %v2773_v10 = vld [vmem:[%s4173_s2 + $0x4c] ss:$16 sps:$4 sm:$0xff]   ;;  %v2775_v11 = vld [vmem:[%s4173_s2 + $0x40] ss:$16 sps:$4 sm:$0xff]   ;;  %v2776_v12 = vld [vmem:[%s4173_s2 + $0x48] ss:$16 sps:$4 sm:$0xff]  }
   0x5   :  { %v2777_v13 = vld [vmem:[%s4173_s2 + $0x64] ss:$16 sps:$4 sm:$0xff]   ;;  %v2779_v14 = vld [vmem:[%s4173_s2 + $0x6c] ss:$16 sps:$4 sm:$0xff]   ;;  %v2781_v15 = vld [vmem:[%s4173_s2 + $0x60] ss:$16 sps:$4 sm:$0xff]  }
   0x6   :  { %v2782_v16 = vld [vmem:[%s4173_s2 + $0x68] ss:$16 sps:$4 sm:$0xff]   ;;  %v2783_v17 = vld [vmem:[%s4173_s2 + $0x84] ss:$16 sps:$4 sm:$0xff]   ;;  %v2785_v18 = vld [vmem:[%s4173_s2 + $0x8c] ss:$16 sps:$4 sm:$0xff]  }
   0x7   :  { %323 = vmatpush1.bf16.msra.mxu0 %v2769_v7  ;;  %436 = vmatpush1.bf16.msra.mxu1 %v2770_v8  ;;  %v2787_v19 = vld [vmem:[%s4173_s2 + $0x80] ss:$16 sps:$4 sm:$0xff]   ;;  %v2788_v20 = vld [vmem:[%s4173_s2 + $0x88] ss:$16 sps:$4 sm:$0xff]   ;;  %v2789_v21 = vld [vmem:[%s4173_s2 + $0xa4] ss:$16 sps:$4 sm:$0xff]  }
   0x8   :  { %324 = vmatprep.subr.bf16.mxu0 %v2771_v9  ;;  %437 = vmatprep.subr.bf16.mxu1 %v2773_v10  ;;  %v2791_v22 = vld [vmem:[%s4173_s2 + $0xac] ss:$16 sps:$4 sm:$0xff]   ;;  %v2793_v23 = vld [vmem:[%s4173_s2 + $0xa0] ss:$16 sps:$4 sm:$0xff]   ;;  %v2794_v24 = vld [vmem:[%s4173_s2 + $0xa8] ss:$16 sps:$4 sm:$0xff]   ;;  %v92_v10 = vlaneseq }
   0x9   :  { %v2795_v25 = vld [vmem:[%s4173_s2 + $0xc4] ss:$16 sps:$4 sm:$0xff]   ;;  %v2797_v26 = vld [vmem:[%s4173_s2 + $0xcc] ss:$16 sps:$4 sm:$0xff]   ;;  %v2799_v27 = vld [vmem:[%s4173_s2 + $0xc0] ss:$16 sps:$4 sm:$0xff]  }
   0xa   :  { %v2800_v28 = vld [vmem:[%s4173_s2 + $0xc8] ss:$16 sps:$4 sm:$0xff]   ;;  %v2801_v29 = vld [vmem:[%s4173_s2 + $0xe4] ss:$16 sps:$4 sm:$0xff]   ;;  %v2803_v30 = vld [vmem:[%s4173_s2 + $0xec] ss:$16 sps:$4 sm:$0xff]  }
   0xb   :  { %325 = vmatpush1.bf16.msra.mxu0 %v2775_v11  ;;  %438 = vmatpush1.bf16.msra.mxu1 %v2776_v12  ;;  %v2805_v31 = vld [vmem:[%s4173_s2 + $0xe0] ss:$16 sps:$4 sm:$0xff]   ;;  %v2806_v32 = vld [vmem:[%s4173_s2 + $0xe8] ss:$16 sps:$4 sm:$0xff]   ;;  %v3256_v33 = vld [vmem:[%s4175_s3 + $0x4] ss:$16 sps:$4 sm:$0xff]  }
   0xc   :  { %326 = vmatprep.subr.bf16.mxu0 %v2777_v13  ;;  %439 = vmatprep.subr.bf16.mxu1 %v2779_v14  ;;  %v3261_v34 = vld [vmem:[%s4175_s3 + $0xc] ss:$16 sps:$4 sm:$0xff]   ;;  %v2807_v35 = vld [vmem:[%s4174_s0] sm:$0xff]   ;;  %v3281_v38 = vld [vmem:[%s4175_s3 + $0x8] ss:$16 sps:$4 sm:$0xff]   ;;  %v93_v11 = vshrl.u32 %v92_v10, 7 }
   0xd   :  { %v3269_v36 = vld [vmem:[%s4175_s3] ss:$16 sps:$4 sm:$0xff]   ;;  %v3276_v37 = vld [vmem:[%s4175_s3 + $0x24] ss:$16 sps:$4 sm:$0xff]   ;;  %v3286_v39 = vld [vmem:[%s4175_s3 + $0x2c] ss:$16 sps:$4 sm:$0xff]  }
   0xe   :  { %v3293_v40 = vld [vmem:[%s4175_s3 + $0x20] ss:$16 sps:$4 sm:$0xff]   ;;  %v3300_v41 = vld [vmem:[%s4175_s3 + $0x44] ss:$16 sps:$4 sm:$0xff]   ;;  %v3306_v42 = vld [vmem:[%s4175_s3 + $0x28] ss:$16 sps:$4 sm:$0xff]  }
   0xf   :  { %327 = vmatpush1.bf16.msra.mxu0 %v2781_v15  ;;  %440 = vmatpush1.bf16.msra.mxu1 %v2782_v16  ;;  %v2813_v43 = vld [vmem:[%s4174_s0 + $0x8] sm:$0xff]   ;;  %v3317_v44 = vld [vmem:[%s4175_s3 + $0x40] ss:$16 sps:$4 sm:$0xff]   ;;  %v3327_v46 = vld [vmem:[%s4175_s3 + $0x64] ss:$16 sps:$4 sm:$0xff]   ;;  %v94_v12 = vsub.s32 0, %v93_v11 }
  0x10   :  { %328 = vmatprep.subr.bf16.mxu0 %v2783_v17  ;;  %441 = vmatprep.subr.bf16.mxu1 %v2785_v18  ;;  %v3322_v45 = vld [vmem:[%s4175_s3 + $0x4c] ss:$16 sps:$4 sm:$0xff]   ;;  %v3333_v47 = vld [vmem:[%s4175_s3 + $0x48] ss:$16 sps:$4 sm:$0xff]   ;;  %v3347_v49 = vld [vmem:[%s4175_s3 + $0x60] ss:$16 sps:$4 sm:$0xff]  }
  0x11   :  { %v3338_v48 = vld [vmem:[%s4175_s3 + $0x6c] ss:$16 sps:$4 sm:$0xff]   ;;  %v3352_v50 = vld [vmem:[%s4175_s3 + $0x84] ss:$16 sps:$4 sm:$0xff]   ;;  %v3359_v51 = vld [vmem:[%s4175_s3 + $0x68] ss:$16 sps:$4 sm:$0xff]  }
  0x12   :  { %v2820_v52 = vld [vmem:[%s4174_s0 + $0x10] sm:$0xff]   ;;  %v3374_v54 = vld [vmem:[%s4175_s3 + $0x8c] ss:$16 sps:$4 sm:$0xff]   ;;  %v3386_v56 = vld [vmem:[%s4175_s3 + $0x88] ss:$16 sps:$4 sm:$0xff]   ;;  %v98_v14 = vsub.s32 1, %v93_v11 }
  0x13   :  { %329 = vmatpush1.bf16.msra.mxu0 %v2787_v19  ;;  %442 = vmatpush1.bf16.msra.mxu1 %v2788_v20  ;;  %v3368_v53 = vld [vmem:[%s4175_s3 + $0x80] ss:$16 sps:$4 sm:$0xff]   ;;  %v3381_v55 = vld [vmem:[%s4175_s3 + $0xa4] ss:$16 sps:$4 sm:$0xff]   ;;  %v3391_v57 = vld [vmem:[%s4175_s3 + $0xac] ss:$16 sps:$4 sm:$0xff]  }
  0x14   :  { %330 = vmatprep.subr.bf16.mxu0 %v2789_v21  ;;  %443 = vmatprep.subr.bf16.mxu1 %v2791_v22  ;;  %v3400_v58 = vld [vmem:[%s4175_s3 + $0xa0] ss:$16 sps:$4 sm:$0xff]   ;;  %v3407_v59 = vld [vmem:[%s4175_s3 + $0xc4] ss:$16 sps:$4 sm:$0xff]   ;;  %v3412_v60 = vld [vmem:[%s4175_s3 + $0xa8] ss:$16 sps:$4 sm:$0xff]  }
  0x15   :  { %v2827_v61 = vld [vmem:[%s4174_s0 + $0x18] sm:$0xff]   ;;  %v3422_v62 = vld [vmem:[%s4175_s3 + $0xc0] ss:$16 sps:$4 sm:$0xff]   ;;  %v3434_v0 = vld [vmem:[%s4175_s3 + $0xe4] ss:$16 sps:$4 sm:$0xff]   ;;  %v102_v16 = vsub.s32 2, %v93_v11 }
  0x16   :  { %v3427_v63 = vld [vmem:[%s4175_s3 + $0xcc] ss:$16 sps:$4 sm:$0xff]   ;;  %v3439_v2 = vld [vmem:[%s4175_s3 + $0xc8] ss:$16 sps:$4 sm:$0xff]   ;;  %v3453_v4 = vld [vmem:[%s4175_s3 + $0xe0] ss:$16 sps:$4 sm:$0xff]  }
  0x17   :  { %331 = vmatpush1.bf16.msra.mxu0 %v2793_v23  ;;  %444 = vmatpush1.bf16.msra.mxu1 %v2794_v24  ;;  %v3444_v3 = vld [vmem:[%s4175_s3 + $0xec] ss:$16 sps:$4 sm:$0xff]   ;;  %v3460_v5 = vld [vmem:[%s4175_s3 + $0xe8] ss:$16 sps:$4 sm:$0xff]   ;;  %v2834_v6 = vld [vmem:[%s4174_s0 + $0x20] sm:$0xff]  }
  0x18   :  { %332 = vmatprep.subr.bf16.mxu0 %v2795_v25  ;;  %445 = vmatprep.subr.bf16.mxu1 %v2797_v26  ;;  %v2841_v7 = vld [vmem:[%s4174_s0 + $0x28] sm:$0xff]   ;;  %v2848_v8 = vld [vmem:[%s4174_s0 + $0x30] sm:$0xff]   ;;  %v2855_v9 = vld [vmem:[%s4174_s0 + $0x38] sm:$0xff]  }
  0x19   :  { %v90_v13 = vld [vmem:[%s4176_s4] sm:$0xf] }
  0x1a   :  { %v3526_v15 = vrot.slane %v90_v13, %v94_v12  ;;  %v3528_v17 = vrot.slane %v90_v13, %v98_v14  ;;  %v3531_v21 = vrot.slane %v90_v13, %v102_v16 }
  0x1b   :  { %333 = vmatpush1.bf16.msra.mxu0 %v2799_v27  ;;  %446 = vmatpush1.bf16.msra.mxu1 %v2800_v28 }
  0x1c   :  { %334 = vmatprep.subr.bf16.mxu0 %v2801_v29  ;;  %447 = vmatprep.subr.bf16.mxu1 %v2803_v30 }
  0x1f   :  { %335 = vmatpush1.bf16.msra.mxu0 %v2805_v31  ;;  %448 = vmatpush1.bf16.msra.mxu1 %v2806_v32  ;;  %v106_v32 = vsub.s32 3, %v93_v11 }
  0x20   :  { %813 = vmatprep.subr.bf16.mxu0 %v3256_v33  ;;  %856 = vmatprep.subr.bf16.mxu1 %v3261_v34 }
  0x22   :  { %353 = vmatmul.mubr.bf16.vlgmr.msra.gmra.mrb[0].mxu0 %v2807_v35  ;;  %466 = vmatmul.mubr.bf16.vlgmr.msra.gmra.mrb[0].mxu1 %v2807_v35 }
  0x23   :  { %814 = vmatpush1.bf16.msra.mxu0 %v3269_v36  ;;  %362 = vmatprep.mubr.bf16.mxu0 %v3087_v1 }
  0x24   :  { %475 = vmatprep.mubr.bf16.mxu1 %v3087_v1  ;;  %815 = vmatprep.subr.bf16.mxu0 %v3276_v37 }
  0x25   :  { %857 = vmatpush1.bf16.msra.mxu1 %v3281_v38 }
  0x26   :  { %858 = vmatprep.subr.bf16.mxu1 %v3286_v39 }
  0x27   :  { %816 = vmatpush1.bf16.msra.mxu0 %v3293_v40 }
  0x28   :  { %817 = vmatprep.subr.bf16.mxu0 %v3300_v41 }
  0x29   :  { %859 = vmatpush1.bf16.msra.mxu1 %v3306_v42 }
  0x2a   :  { %363 = vmatmul.mubr.bf16.gmra.mrb[4].mxu0 %v2813_v43  ;;  %476 = vmatmul.mubr.bf16.gmra.mrb[4].mxu1 %v2813_v43 }
  0x2b   :  { %372 = vmatprep.mubr.bf16.mxu0 %v3087_v1  ;;  %485 = vmatprep.mubr.bf16.mxu1 %v3087_v1 }
  0x2c   :  { %818 = vmatpush1.bf16.msra.mxu0 %v3317_v44  ;;  %860 = vmatprep.subr.bf16.mxu1 %v3322_v45 }
  0x2d   :  { %819 = vmatprep.subr.bf16.mxu0 %v3327_v46  ;;  %861 = vmatpush1.bf16.msra.mxu1 %v3333_v47 }
  0x2e   :  { %862 = vmatprep.subr.bf16.mxu1 %v3338_v48 }
  0x30   :  { %820 = vmatpush1.bf16.msra.mxu0 %v3347_v49 }
  0x31   :  { %821 = vmatprep.subr.bf16.mxu0 %v3352_v50  ;;  %863 = vmatpush1.bf16.msra.mxu1 %v3359_v51 }
  0x32   :  { %373 = vmatmul.mubr.bf16.gmra.mrb[8].mxu0 %v2820_v52  ;;  %486 = vmatmul.mubr.bf16.gmra.mrb[8].mxu1 %v2820_v52 }
  0x33   :  { %382 = vmatprep.mubr.bf16.mxu0 %v3087_v1  ;;  %495 = vmatprep.mubr.bf16.mxu1 %v3087_v1 }
  0x34   :  { %822 = vmatpush1.bf16.msra.mxu0 %v3368_v53  ;;  %864 = vmatprep.subr.bf16.mxu1 %v3374_v54 }
  0x35   :  { %823 = vmatprep.subr.bf16.mxu0 %v3381_v55  ;;  %865 = vmatpush1.bf16.msra.mxu1 %v3386_v56 }
  0x36   :  { %866 = vmatprep.subr.bf16.mxu1 %v3391_v57 }
  0x38   :  { %824 = vmatpush1.bf16.msra.mxu0 %v3400_v58 }
  0x39   :  { %825 = vmatprep.subr.bf16.mxu0 %v3407_v59  ;;  %867 = vmatpush1.bf16.msra.mxu1 %v3412_v60 }
  0x3a   :  { %383 = vmatmul.mubr.bf16.gmra.mrb[12].mxu0 %v2827_v61  ;;  %496 = vmatmul.mubr.bf16.gmra.mrb[12].mxu1 %v2827_v61 }
  0x3b   :  { %392 = vmatprep.mubr.bf16.mxu0 %v3087_v1  ;;  %505 = vmatprep.mubr.bf16.mxu1 %v3087_v1 }
  0x3c   :  { %826 = vmatpush1.bf16.msra.mxu0 %v3422_v62  ;;  %868 = vmatprep.subr.bf16.mxu1 %v3427_v63 }
  0x3d   :  { %827 = vmatprep.subr.bf16.mxu0 %v3434_v0  ;;  %869 = vmatpush1.bf16.msra.mxu1 %v3439_v2 }
  0x3e   :  { %870 = vmatprep.subr.bf16.mxu1 %v3444_v3 }
  0x40   :  { %828 = vmatpush1.bf16.msra.mxu0 %v3453_v4 }
  0x41   :  { %871 = vmatpush1.bf16.msra.mxu1 %v3460_v5  ;;  %955 = vmatprep.subr.bf16.mxu0 %v3256_v33 }
  0x42   :  { %393 = vmatmul.mubr.bf16.gmra.mrb[16].mxu0 %v2834_v6  ;;  %506 = vmatmul.mubr.bf16.gmra.mrb[16].mxu1 %v2834_v6  ;;  %v3537_v6 = vrot.slane %v90_v13, %v106_v32 }
  0x43   :  { %402 = vmatprep.mubr.bf16.mxu0 %v3087_v1  ;;  %515 = vmatprep.mubr.bf16.mxu1 %v3087_v1 }
  0x44   :  { %998 = vmatprep.subr.bf16.mxu1 %v3261_v34 }
  0x4a   :  { %403 = vmatmul.mubr.bf16.gmra.mrb[20].mxu0 %v2841_v7  ;;  %516 = vmatmul.mubr.bf16.gmra.mrb[20].mxu1 %v2841_v7 }
  0x4b   :  { %412 = vmatprep.mubr.bf16.mxu0 %v3087_v1  ;;  %525 = vmatprep.mubr.bf16.mxu1 %v3087_v1 }
  0x52   :  { %413 = vmatmul.mubr.bf16.gmra.mrb[24].mxu0 %v2848_v8  ;;  %526 = vmatmul.mubr.bf16.gmra.mrb[24].mxu1 %v2848_v8 }
  0x53   :  { %422 = vmatprep.mubr.bf16.mxu0 %v3087_v1  ;;  %535 = vmatprep.mubr.bf16.mxu1 %v3087_v1 }
  0x5a   :  { %423 = vmatmul.mubr.bf16.gmra.mrb[28].mxu0 %v2855_v9  ;;  %536 = vmatmul.mubr.bf16.gmra.mrb[28].mxu1 %v2855_v9 }
  0x5b   :  { %845 = vmatprep.mubr.bf16.mxu0 %v3087_v1  ;;  %888 = vmatprep.mubr.bf16.mxu1 %v3087_v1 }
  0x62   :  { %846 = vmatmul.mubr.bf16.vlgmr.msra.gmra.mrb[0].mxu0 %v3087_v1  ;;  %889 = vmatmul.mubr.bf16.vlgmr.msra.gmra.mrb[0].mxu1 %v3087_v1 }
  0x63   :  { %956 = vmatpush1.bf16.msra.mxu0 %v3269_v36  ;;  %999 = vmatpush1.bf16.msra.mxu1 %v3281_v38 }
  0x64   :  { %957 = vmatprep.subr.bf16.mxu0 %v3276_v37  ;;  %1000 = vmatprep.subr.bf16.mxu1 %v3286_v39 }
  0x65   :  { %987 = vmatprep.mubr.bf16.mxu0 %v3087_v1  ;;  %1030 = vmatprep.mubr.bf16.mxu1 %v3087_v1 }
  0x67   :  { %958 = vmatpush1.bf16.msra.mxu0 %v3293_v40  ;;  %1001 = vmatpush1.bf16.msra.mxu1 %v3306_v42 }
  0x68   :  { %959 = vmatprep.subr.bf16.mxu0 %v3300_v41  ;;  %1002 = vmatprep.subr.bf16.mxu1 %v3322_v45 }
  0x6b   :  { %960 = vmatpush1.bf16.msra.mxu0 %v3317_v44  ;;  %1003 = vmatpush1.bf16.msra.mxu1 %v3333_v47 }
  0x6c   :  { %961 = vmatprep.subr.bf16.mxu0 %v3327_v46  ;;  %1004 = vmatprep.subr.bf16.mxu1 %v3338_v48 }
  0x6f   :  { %962 = vmatpush1.bf16.msra.mxu0 %v3347_v49  ;;  %1005 = vmatpush1.bf16.msra.mxu1 %v3359_v51 }
  0x70   :  { %963 = vmatprep.subr.bf16.mxu0 %v3352_v50  ;;  %1006 = vmatprep.subr.bf16.mxu1 %v3374_v54 }
  0x73   :  { %964 = vmatpush1.bf16.msra.mxu0 %v3368_v53  ;;  %1007 = vmatpush1.bf16.msra.mxu1 %v3386_v56 }
  0x74   :  { %965 = vmatprep.subr.bf16.mxu0 %v3381_v55  ;;  %1008 = vmatprep.subr.bf16.mxu1 %v3391_v57 }
  0x77   :  { %966 = vmatpush1.bf16.msra.mxu0 %v3400_v58  ;;  %1009 = vmatpush1.bf16.msra.mxu1 %v3412_v60 }
  0x78   :  { %967 = vmatprep.subr.bf16.mxu0 %v3407_v59  ;;  %1010 = vmatprep.subr.bf16.mxu1 %v3427_v63 }
  0x7b   :  { %968 = vmatpush1.bf16.msra.mxu0 %v3422_v62  ;;  %1011 = vmatpush1.bf16.msra.mxu1 %v3439_v2 }
  0x7c   :  { %969 = vmatprep.subr.bf16.mxu0 %v3434_v0  ;;  %1012 = vmatprep.subr.bf16.mxu1 %v3444_v3 }
  0x7f   :  { %970 = vmatpush1.bf16.msra.mxu0 %v3453_v4  ;;  %1013 = vmatpush1.bf16.msra.mxu1 %v3460_v5 }
  0x80   :  { %1097 = vmatprep.subr.bf16.mxu0 %v3256_v33  ;;  %1140 = vmatprep.subr.bf16.mxu1 %v3261_v34 }
 0x135   :  { %v847_v18 = vpop.f32.mrb[0].mxu0  ;;  %v890_v19 = vpop.f32.mrb[0].mxu1 }
 0x136   :  { %v2628_v20 = vadd.f32 %v847_v18, %v3526_v15  ;;  %v849_v22 = vpop.f32.mrb[1].mxu0  ;;  %v892_v23 = vpop.f32.mrb[1].mxu1  ;;  %v2660_v43 = vadd.f32 %v890_v19, %v3531_v21 }
 0x137   :  { %v2629_v24 = vadd.f32 %v849_v22, %v3528_v17  ;;  %v851_v25 = vpop.f32.mrb[2].mxu0  ;;  %v894_v26 = vpop.f32.mrb[2].mxu1  ;;  %v2661_v8 = vadd.f32 %v892_v23, %v3537_v6 }
 0x138   :  { %v907_v27 = vmul.f32 0.5, %v2628_v20  ;;  %v2630_v28 = vadd.f32 %v851_v25, %v3526_v15  ;;  %v853_v29 = vpop.f32.mrb[3].mxu0  ;;  %v896_v30 = vpop.f32.mrb[3].mxu1  ;;  %v2662_v7 = vadd.f32 %v894_v26, %v3531_v21 }
 0x139   :  { %v915_v31 = vmul.f32 0.5, %v2629_v24  ;;  %v2631_v35 = vadd.f32 %v853_v29, %v3528_v17  ;;  %v2663_v9 = vadd.f32 %v896_v30, %v3537_v6  ;;  %v925_v14 = vmul.f32 0.5, %v2661_v8 }
 0x13a   :  { %2895 = vtanh.f32 %v907_v27  ;;  %v908_v52 = vmul.f32 0.5, %v2630_v28 }
 0x13b   :  { %2897 = vtanh.f32 %v915_v31  ;;  %v916_v61 = vmul.f32 0.5, %v2631_v35  ;;  %v926_v18 = vmul.f32 0.5, %v2663_v9 }
 0x13c   :  { %2899 = vtanh.f32 %v908_v52 }
 0x13d   :  { %2901 = vtanh.f32 %v2660_v43 }
 0x13e   :  { %2903 = vtanh.f32 %v916_v61 }
 0x13f   :  { %2905 = vtanh.f32 %v2662_v7 }
 0x140   :  { %2907 = vtanh.f32 %v925_v14 }
 0x141   :  { %2909 = vtanh.f32 %v926_v18 }
 0x144   :  { %v2896_v10 = vpop.eup %2895 }
 0x145   :  { %v2898_v11 = vpop.eup %2897  ;;  %v911_v12 = vadd.f32 1.0, %v2896_v10 }
 0x146   :  { %v919_v16 = vadd.f32 1.0, %v2898_v11  ;;  %v2900_v19 = vpop.eup %2899 }
 0x147   :  { %v913_v20 = vmul.f32 0.5, %v911_v12  ;;  %v2902_v13 = vpop.eup %2901  ;;  %v912_v24 = vadd.f32 1.0, %v2900_v19 }
 0x148   :  { %v921_v22 = vmul.f32 0.5, %v919_v16  ;;  %v2904_v25 = vpop.eup %2903 }
 0x149   :  { %v935_v26 = vmul.f32 %v2902_v13, %v913_v20  ;;  %v914_v28 = vmul.f32 0.5, %v912_v24  ;;  %v920_v23 = vadd.f32 1.0, %v2904_v25  ;;  %v2906_v29 = vpop.eup %2905 }
 0x14a   :  { %v933_v27 = vmul.f32 0.0, %v921_v22  ;;  %v2908_v52 = vpop.eup %2907 }
 0x14b   :  { %v922_v31 = vmul.f32 0.5, %v920_v23  ;;  %v936_v32 = vmul.f32 %v2906_v29, %v914_v28  ;;  %v2910_v61 = vpop.eup %2909  ;;  %v929_v7 = vadd.f32 1.0, %v2908_v52 }
 0x14c   :  { %v3542_v30 = vadd.f32 %v935_v26, %v933_v27  ;;  %v930_v8 = vadd.f32 1.0, %v2910_v61 }
 0x14d   :  { %v934_v35 = vmul.f32 0.0, %v922_v31  ;;  %v931_v10 = vmul.f32 0.5, %v929_v7 }
 0x14e   :  { %2911 = vtanh.f32 %v3542_v30  ;;  %v932_v11 = vmul.f32 0.5, %v930_v8 }
 0x14f   :  { %v3545_v43 = vadd.f32 %v936_v32, %v934_v35 }
 0x151   :  { %2913 = vtanh.f32 %v3545_v43 }
 0x158   :  { %v2912_v9 = vpop.eup %2911 }
 0x159   :  { %v941_v14 = vmul.f32 %v2912_v9, %v931_v10 }
 0x15b   :  { %v2914_v12 = vpop.eup %2913 }
 0x15c   :  { %v942_v16 = vmul.f32 %v2914_v12, %v932_v11 }
 0x15e   :  { %v954_v18 = vpack.c.bf16 %v942_v16, %v941_v14 }
 0x160   :  { %988 = vmatmul.mubr.bf16.vlgmr.msra.gmra.mrb[4].mxu0 %v954_v18  ;;  %1031 = vmatmul.mubr.bf16.vlgmr.msra.gmra.mrb[4].mxu1 %v954_v18 }
 0x161   :  { %1098 = vmatpush1.bf16.msra.mxu0 %v3269_v36  ;;  %1141 = vmatpush1.bf16.msra.mxu1 %v3281_v38 }
 0x162   :  { %1099 = vmatprep.subr.bf16.mxu0 %v3276_v37  ;;  %1142 = vmatprep.subr.bf16.mxu1 %v3286_v39 }
 0x163   :  { %1129 = vmatprep.mubr.bf16.mxu0 %v3087_v1  ;;  %1172 = vmatprep.mubr.bf16.mxu1 %v3087_v1 }
 0x165   :  { %1100 = vmatpush1.bf16.msra.mxu0 %v3293_v40  ;;  %1143 = vmatpush1.bf16.msra.mxu1 %v3306_v42 }
 0x166   :  { %1101 = vmatprep.subr.bf16.mxu0 %v3300_v41  ;;  %1144 = vmatprep.subr.bf16.mxu1 %v3322_v45 }
 0x169   :  { %1102 = vmatpush1.bf16.msra.mxu0 %v3317_v44  ;;  %1145 = vmatpush1.bf16.msra.mxu1 %v3333_v47 }
 0x16a   :  { %1103 = vmatprep.subr.bf16.mxu0 %v3327_v46  ;;  %1146 = vmatprep.subr.bf16.mxu1 %v3338_v48 }
 0x16d   :  { %1104 = vmatpush1.bf16.msra.mxu0 %v3347_v49  ;;  %1147 = vmatpush1.bf16.msra.mxu1 %v3359_v51 }
 0x16e   :  { %1105 = vmatprep.subr.bf16.mxu0 %v3352_v50  ;;  %1148 = vmatprep.subr.bf16.mxu1 %v3374_v54 }
 0x171   :  { %1106 = vmatpush1.bf16.msra.mxu0 %v3368_v53  ;;  %1149 = vmatpush1.bf16.msra.mxu1 %v3386_v56 }
 0x172   :  { %1107 = vmatprep.subr.bf16.mxu0 %v3381_v55  ;;  %1150 = vmatprep.subr.bf16.mxu1 %v3391_v57 }
 0x175   :  { %1108 = vmatpush1.bf16.msra.mxu0 %v3400_v58  ;;  %1151 = vmatpush1.bf16.msra.mxu1 %v3412_v60 }
 0x176   :  { %1109 = vmatprep.subr.bf16.mxu0 %v3407_v59  ;;  %1152 = vmatprep.subr.bf16.mxu1 %v3427_v63 }
 0x179   :  { %1110 = vmatpush1.bf16.msra.mxu0 %v3422_v62  ;;  %1153 = vmatpush1.bf16.msra.mxu1 %v3439_v2 }
 0x17a   :  { %1111 = vmatprep.subr.bf16.mxu0 %v3434_v0  ;;  %1154 = vmatprep.subr.bf16.mxu1 %v3444_v3 }
 0x17d   :  { %1112 = vmatpush1.bf16.msra.mxu0 %v3453_v4  ;;  %1155 = vmatpush1.bf16.msra.mxu1 %v3460_v5 }
 0x17e   :  { %1239 = vmatprep.subr.bf16.mxu0 %v3256_v33  ;;  %1282 = vmatprep.subr.bf16.mxu1 %v3261_v34 }
 0x233   :  { %v989_v19 = vpop.f32.mrb[4].mxu0  ;;  %v1032_v20 = vpop.f32.mrb[4].mxu1 }
 0x234   :  { %v2632_v13 = vadd.f32 %v989_v19, %v3526_v15  ;;  %v991_v22 = vpop.f32.mrb[5].mxu0  ;;  %v1034_v24 = vpop.f32.mrb[5].mxu1  ;;  %v2664_v52 = vadd.f32 %v1032_v20, %v3531_v21 }
 0x235   :  { %v2633_v25 = vadd.f32 %v991_v22, %v3528_v17  ;;  %v993_v26 = vpop.f32.mrb[6].mxu0  ;;  %v1036_v27 = vpop.f32.mrb[6].mxu1  ;;  %v2665_v9 = vadd.f32 %v1034_v24, %v3537_v6 }
 0x236   :  { %v1049_v28 = vmul.f32 0.5, %v2632_v13  ;;  %v2634_v23 = vadd.f32 %v993_v26, %v3526_v15  ;;  %v995_v29 = vpop.f32.mrb[7].mxu0  ;;  %v1038_v31 = vpop.f32.mrb[7].mxu1  ;;  %v2666_v8 = vadd.f32 %v1036_v27, %v3531_v21 }
 0x237   :  { %v1057_v32 = vmul.f32 0.5, %v2633_v25  ;;  %v2635_v35 = vadd.f32 %v995_v29, %v3528_v17  ;;  %v2667_v10 = vadd.f32 %v1038_v31, %v3537_v6  ;;  %v1067_v16 = vmul.f32 0.5, %v2665_v9 }
 0x238   :  { %2915 = vtanh.f32 %v1049_v28  ;;  %v1050_v61 = vmul.f32 0.5, %v2634_v23 }
 0x239   :  { %2917 = vtanh.f32 %v1057_v32  ;;  %v1058_v7 = vmul.f32 0.5, %v2635_v35  ;;  %v1068_v19 = vmul.f32 0.5, %v2667_v10 }
 0x23a   :  { %2919 = vtanh.f32 %v1050_v61 }
 0x23b   :  { %2921 = vtanh.f32 %v2664_v52 }
 0x23c   :  { %2923 = vtanh.f32 %v1058_v7 }
 0x23d   :  { %2925 = vtanh.f32 %v2666_v8 }
 0x23e   :  { %2927 = vtanh.f32 %v1067_v16 }
 0x23f   :  { %2929 = vtanh.f32 %v1068_v19 }
 0x242   :  { %v2916_v11 = vpop.eup %2915 }
 0x243   :  { %v2918_v12 = vpop.eup %2917  ;;  %v1053_v14 = vadd.f32 1.0, %v2916_v11 }
 0x244   :  { %v1061_v18 = vadd.f32 1.0, %v2918_v12  ;;  %v2920_v20 = vpop.eup %2919 }
 0x245   :  { %v1055_v13 = vmul.f32 0.5, %v1053_v14  ;;  %v2922_v22 = vpop.eup %2921  ;;  %v1054_v26 = vadd.f32 1.0, %v2920_v20 }
 0x246   :  { %v1063_v25 = vmul.f32 0.5, %v1061_v18  ;;  %v2924_v28 = vpop.eup %2923 }
 0x247   :  { %v1077_v27 = vmul.f32 %v2922_v22, %v1055_v13  ;;  %v1056_v24 = vmul.f32 0.5, %v1054_v26  ;;  %v1062_v29 = vadd.f32 1.0, %v2924_v28  ;;  %v2926_v31 = vpop.eup %2925 }
 0x248   :  { %v1075_v23 = vmul.f32 %v1063_v25, %v3542_v30  ;;  %v2928_v8 = vpop.eup %2927 }
 0x249   :  { %v1064_v35 = vmul.f32 0.5, %v1062_v29  ;;  %v1078_v52 = vmul.f32 %v2926_v31, %v1056_v24  ;;  %v2930_v9 = vpop.eup %2929  ;;  %v1071_v10 = vadd.f32 1.0, %v2928_v8 }
 0x24a   :  { %v3591_v32 = vadd.f32 %v1077_v27, %v1075_v23  ;;  %v1072_v30 = vadd.f32 1.0, %v2930_v9 }
 0x24b   :  { %v1076_v61 = vmul.f32 %v1064_v35, %v3545_v43  ;;  %v1073_v12 = vmul.f32 0.5, %v1071_v10 }
 0x24c   :  { %2931 = vtanh.f32 %v3591_v32  ;;  %v1074_v14 = vmul.f32 0.5, %v1072_v30 }
 0x24d   :  { %v3595_v7 = vadd.f32 %v1078_v52, %v1076_v61 }
 0x24f   :  { %2933 = vtanh.f32 %v3595_v7 }
 0x256   :  { %v2932_v11 = vpop.eup %2931 }
 0x257   :  { %v1083_v18 = vmul.f32 %v2932_v11, %v1073_v12 }
 0x259   :  { %v2934_v16 = vpop.eup %2933 }
 0x25a   :  { %v1084_v19 = vmul.f32 %v2934_v16, %v1074_v14 }
 0x25c   :  { %v1096_v20 = vpack.c.bf16 %v1084_v19, %v1083_v18 }
 0x25e   :  { %1130 = vmatmul.mubr.bf16.vlgmr.msra.gmra.mrb[8].mxu0 %v1096_v20  ;;  %1173 = vmatmul.mubr.bf16.vlgmr.msra.gmra.mrb[8].mxu1 %v1096_v20 }
 0x25f   :  { %1240 = vmatpush1.bf16.msra.mxu0 %v3269_v36  ;;  %1283 = vmatpush1.bf16.msra.mxu1 %v3281_v38 }
 0x260   :  { %1241 = vmatprep.subr.bf16.mxu0 %v3276_v37  ;;  %1284 = vmatprep.subr.bf16.mxu1 %v3286_v39 }
 0x261   :  { %1271 = vmatprep.mubr.bf16.mxu0 %v3087_v1  ;;  %1314 = vmatprep.mubr.bf16.mxu1 %v3087_v1 }
 0x263   :  { %1242 = vmatpush1.bf16.msra.mxu0 %v3293_v40  ;;  %1285 = vmatpush1.bf16.msra.mxu1 %v3306_v42 }
 0x264   :  { %1243 = vmatprep.subr.bf16.mxu0 %v3300_v41  ;;  %1286 = vmatprep.subr.bf16.mxu1 %v3322_v45 }
 0x267   :  { %1244 = vmatpush1.bf16.msra.mxu0 %v3317_v44  ;;  %1287 = vmatpush1.bf16.msra.mxu1 %v3333_v47 }
 0x268   :  { %1245 = vmatprep.subr.bf16.mxu0 %v3327_v46  ;;  %1288 = vmatprep.subr.bf16.mxu1 %v3338_v48 }
 0x26b   :  { %1246 = vmatpush1.bf16.msra.mxu0 %v3347_v49  ;;  %1289 = vmatpush1.bf16.msra.mxu1 %v3359_v51 }
 0x26c   :  { %1247 = vmatprep.subr.bf16.mxu0 %v3352_v50  ;;  %1290 = vmatprep.subr.bf16.mxu1 %v3374_v54 }
 0x26f   :  { %1248 = vmatpush1.bf16.msra.mxu0 %v3368_v53  ;;  %1291 = vmatpush1.bf16.msra.mxu1 %v3386_v56 }
 0x270   :  { %1249 = vmatprep.subr.bf16.mxu0 %v3381_v55  ;;  %1292 = vmatprep.subr.bf16.mxu1 %v3391_v57 }
 0x273   :  { %1250 = vmatpush1.bf16.msra.mxu0 %v3400_v58  ;;  %1293 = vmatpush1.bf16.msra.mxu1 %v3412_v60 }
 0x274   :  { %1251 = vmatprep.subr.bf16.mxu0 %v3407_v59  ;;  %1294 = vmatprep.subr.bf16.mxu1 %v3427_v63 }
 0x277   :  { %1252 = vmatpush1.bf16.msra.mxu0 %v3422_v62  ;;  %1295 = vmatpush1.bf16.msra.mxu1 %v3439_v2 }
 0x278   :  { %1253 = vmatprep.subr.bf16.mxu0 %v3434_v0  ;;  %1296 = vmatprep.subr.bf16.mxu1 %v3444_v3 }
 0x27b   :  { %1254 = vmatpush1.bf16.msra.mxu0 %v3453_v4  ;;  %1297 = vmatpush1.bf16.msra.mxu1 %v3460_v5 }
 0x27c   :  { %1381 = vmatprep.subr.bf16.mxu0 %v3256_v33  ;;  %1424 = vmatprep.subr.bf16.mxu1 %v3261_v34 }
 0x331   :  { %v1131_v43 = vpop.f32.mrb[8].mxu0  ;;  %v1174_v13 = vpop.f32.mrb[8].mxu1 }
 0x332   :  { %v2636_v22 = vadd.f32 %v1131_v43, %v3526_v15  ;;  %v1133_v25 = vpop.f32.mrb[9].mxu0  ;;  %v1176_v26 = vpop.f32.mrb[9].mxu1  ;;  %v2668_v8 = vadd.f32 %v1174_v13, %v3531_v21 }
 0x333   :  { %v2637_v28 = vadd.f32 %v1133_v25, %v3528_v17  ;;  %v1135_v27 = vpop.f32.mrb[10].mxu0  ;;  %v1178_v23 = vpop.f32.mrb[10].mxu1  ;;  %v2669_v11 = vadd.f32 %v1176_v26, %v3537_v6 }
 0x334   :  { %v1191_v24 = vmul.f32 0.5, %v2636_v22  ;;  %v2638_v29 = vadd.f32 %v1135_v27, %v3526_v15  ;;  %v1137_v31 = vpop.f32.mrb[11].mxu0  ;;  %v1180_v35 = vpop.f32.mrb[11].mxu1  ;;  %v2670_v30 = vadd.f32 %v1178_v23, %v3531_v21 }
 0x335   :  { %v1199_v52 = vmul.f32 0.5, %v2637_v28  ;;  %v2639_v61 = vadd.f32 %v1137_v31, %v3528_v17  ;;  %v2671_v12 = vadd.f32 %v1180_v35, %v3537_v6  ;;  %v1209_v19 = vmul.f32 0.5, %v2669_v11 }
 0x336   :  { %2935 = vtanh.f32 %v1191_v24  ;;  %v1192_v9 = vmul.f32 0.5, %v2638_v29 }
 0x337   :  { %2937 = vtanh.f32 %v1199_v52  ;;  %v1200_v10 = vmul.f32 0.5, %v2639_v61  ;;  %v1210_v43 = vmul.f32 0.5, %v2671_v12 }
 0x338   :  { %2939 = vtanh.f32 %v1192_v9 }
 0x339   :  { %2941 = vtanh.f32 %v2668_v8 }
 0x33a   :  { %2943 = vtanh.f32 %v1200_v10 }
 0x33b   :  { %2945 = vtanh.f32 %v2670_v30 }
 0x33c   :  { %2947 = vtanh.f32 %v1209_v19 }
 0x33d   :  { %2949 = vtanh.f32 %v1210_v43 }
 0x340   :  { %v2936_v14 = vpop.eup %2935 }
 0x341   :  { %v2938_v16 = vpop.eup %2937  ;;  %v1195_v18 = vadd.f32 1.0, %v2936_v14 }
 0x342   :  { %v1203_v20 = vadd.f32 1.0, %v2938_v16  ;;  %v2940_v13 = vpop.eup %2939 }
 0x343   :  { %v1197_v22 = vmul.f32 0.5, %v1195_v18  ;;  %v2942_v25 = vpop.eup %2941  ;;  %v1196_v27 = vadd.f32 1.0, %v2940_v13 }
 0x344   :  { %v1205_v28 = vmul.f32 0.5, %v1203_v20  ;;  %v2944_v24 = vpop.eup %2943 }
 0x345   :  { %v1219_v23 = vmul.f32 %v2942_v25, %v1197_v22  ;;  %v1198_v26 = vmul.f32 0.5, %v1196_v27  ;;  %v1204_v31 = vadd.f32 1.0, %v2944_v24  ;;  %v2946_v35 = vpop.eup %2945 }
 0x346   :  { %v1217_v29 = vmul.f32 %v1205_v28, %v3591_v32  ;;  %v2948_v30 = vpop.eup %2947 }
 0x347   :  { %v1206_v61 = vmul.f32 0.5, %v1204_v31  ;;  %v1220_v8 = vmul.f32 %v2946_v35, %v1198_v26  ;;  %v2950_v11 = vpop.eup %2949  ;;  %v1213_v12 = vadd.f32 1.0, %v2948_v30 }
 0x348   :  { %v3641_v52 = vadd.f32 %v1219_v23, %v1217_v29  ;;  %v1214_v32 = vadd.f32 1.0, %v2950_v11 }
 0x349   :  { %v1218_v9 = vmul.f32 %v1206_v61, %v3595_v7  ;;  %v1215_v16 = vmul.f32 0.5, %v1213_v12 }
 0x34a   :  { %2951 = vtanh.f32 %v3641_v52  ;;  %v1216_v18 = vmul.f32 0.5, %v1214_v32 }
 0x34b   :  { %v3645_v10 = vadd.f32 %v1220_v8, %v1218_v9 }
 0x34d   :  { %2953 = vtanh.f32 %v3645_v10 }
 0x354   :  { %v2952_v14 = vpop.eup %2951 }
 0x355   :  { %v1225_v20 = vmul.f32 %v2952_v14, %v1215_v16 }
 0x357   :  { %v2954_v19 = vpop.eup %2953 }
 0x358   :  { %v1226_v43 = vmul.f32 %v2954_v19, %v1216_v18 }
 0x35a   :  { %v1238_v13 = vpack.c.bf16 %v1226_v43, %v1225_v20 }
 0x35c   :  { %1272 = vmatmul.mubr.bf16.vlgmr.msra.gmra.mrb[12].mxu0 %v1238_v13  ;;  %1315 = vmatmul.mubr.bf16.vlgmr.msra.gmra.mrb[12].mxu1 %v1238_v13 }
 0x35d   :  { %1382 = vmatpush1.bf16.msra.mxu0 %v3269_v36  ;;  %1425 = vmatpush1.bf16.msra.mxu1 %v3281_v38 }
 0x35e   :  { %1383 = vmatprep.subr.bf16.mxu0 %v3276_v37  ;;  %1426 = vmatprep.subr.bf16.mxu1 %v3286_v39 }
 0x35f   :  { %1413 = vmatprep.mubr.bf16.mxu0 %v3087_v1  ;;  %1456 = vmatprep.mubr.bf16.mxu1 %v3087_v1 }
 0x361   :  { %1384 = vmatpush1.bf16.msra.mxu0 %v3293_v40  ;;  %1427 = vmatpush1.bf16.msra.mxu1 %v3306_v42 }
 0x362   :  { %1385 = vmatprep.subr.bf16.mxu0 %v3300_v41  ;;  %1428 = vmatprep.subr.bf16.mxu1 %v3322_v45 }
 0x365   :  { %1386 = vmatpush1.bf16.msra.mxu0 %v3317_v44  ;;  %1429 = vmatpush1.bf16.msra.mxu1 %v3333_v47 }
 0x366   :  { %1387 = vmatprep.subr.bf16.mxu0 %v3327_v46  ;;  %1430 = vmatprep.subr.bf16.mxu1 %v3338_v48 }
 0x369   :  { %1388 = vmatpush1.bf16.msra.mxu0 %v3347_v49  ;;  %1431 = vmatpush1.bf16.msra.mxu1 %v3359_v51 }
 0x36a   :  { %1389 = vmatprep.subr.bf16.mxu0 %v3352_v50  ;;  %1432 = vmatprep.subr.bf16.mxu1 %v3374_v54 }
 0x36d   :  { %1390 = vmatpush1.bf16.msra.mxu0 %v3368_v53  ;;  %1433 = vmatpush1.bf16.msra.mxu1 %v3386_v56 }
 0x36e   :  { %1391 = vmatprep.subr.bf16.mxu0 %v3381_v55  ;;  %1434 = vmatprep.subr.bf16.mxu1 %v3391_v57 }
 0x371   :  { %1392 = vmatpush1.bf16.msra.mxu0 %v3400_v58  ;;  %1435 = vmatpush1.bf16.msra.mxu1 %v3412_v60 }
 0x372   :  { %1393 = vmatprep.subr.bf16.mxu0 %v3407_v59  ;;  %1436 = vmatprep.subr.bf16.mxu1 %v3427_v63 }
 0x375   :  { %1394 = vmatpush1.bf16.msra.mxu0 %v3422_v62  ;;  %1437 = vmatpush1.bf16.msra.mxu1 %v3439_v2 }
 0x376   :  { %1395 = vmatprep.subr.bf16.mxu0 %v3434_v0  ;;  %1438 = vmatprep.subr.bf16.mxu1 %v3444_v3 }
 0x379   :  { %1396 = vmatpush1.bf16.msra.mxu0 %v3453_v4  ;;  %1439 = vmatpush1.bf16.msra.mxu1 %v3460_v5 }
 0x37a   :  { %1523 = vmatprep.subr.bf16.mxu0 %v3256_v33  ;;  %1566 = vmatprep.subr.bf16.mxu1 %v3261_v34 }
 0x42f   :  { %v1273_v36 = vpop.f32.mrb[12].mxu0  ;;  %v1316_v37 = vpop.f32.mrb[12].mxu1 }
 0x430   :  { %v2640_v38 = vadd.f32 %v1273_v36, %v3526_v15  ;;  %v1275_v39 = vpop.f32.mrb[13].mxu0  ;;  %v1318_v40 = vpop.f32.mrb[13].mxu1  ;;  %v2672_v34 = vadd.f32 %v1316_v37, %v3531_v21 }
 0x431   :  { %v2641_v41 = vadd.f32 %v1275_v39, %v3528_v17  ;;  %v1277_v42 = vpop.f32.mrb[14].mxu0  ;;  %v1320_v44 = vpop.f32.mrb[14].mxu1  ;;  %v2673_v24 = vadd.f32 %v1318_v40, %v3537_v6 }
 0x432   :  { %v1333_v45 = vmul.f32 0.5, %v2640_v38  ;;  %v2642_v46 = vadd.f32 %v1277_v42, %v3526_v15  ;;  %v1279_v47 = vpop.f32.mrb[15].mxu0  ;;  %v1322_v7 = vpop.f32.mrb[15].mxu1  ;;  %v2674_v27 = vadd.f32 %v1320_v44, %v3531_v21 }
 0x433   :  { %v1341_v22 = vmul.f32 0.5, %v2641_v41  ;;  %v2643_v33 = vadd.f32 %v1279_v47, %v3528_v17  ;;  %v2675_v23 = vadd.f32 %v1322_v7, %v3537_v6  ;;  %v1351_v35 = vmul.f32 0.5, %v2673_v24  ;;  %v3733_v24 = vld [vmem:[%s4175_s3 + $0x28] ss:$16 sps:$4 sm:$0xff]  }
 0x434   :  { %2955 = vtanh.f32 %v1333_v45  ;;  %v1334_v25 = vmul.f32 0.5, %v2642_v46 }
 0x435   :  { %2957 = vtanh.f32 %v1341_v22  ;;  %v1342_v28 = vmul.f32 0.5, %v2643_v33  ;;  %v1352_v8 = vmul.f32 0.5, %v2675_v23  ;;  %v3739_v23 = vld [vmem:[%s4175_s3 + $0x44] ss:$16 sps:$4 sm:$0xff]  }
 0x436   :  { %2959 = vtanh.f32 %v1334_v25  ;;  %v3713_v25 = vld [vmem:[%s4175_s3 + $0x24] ss:$16 sps:$4 sm:$0xff]  }
 0x437   :  { %2961 = vtanh.f32 %v2672_v34  ;;  %v3707_v34 = vld [vmem:[%s4175_s3 + $0x8] ss:$16 sps:$4 sm:$0xff]  }
 0x438   :  { %2963 = vtanh.f32 %v1342_v28  ;;  %v3719_v28 = vld [vmem:[%s4175_s3 + $0x2c] ss:$16 sps:$4 sm:$0xff]  }
 0x439   :  { %2965 = vtanh.f32 %v2674_v27  ;;  %v3727_v27 = vld [vmem:[%s4175_s3 + $0x20] ss:$16 sps:$4 sm:$0xff]  }
 0x43a   :  { %2967 = vtanh.f32 %v1351_v35  ;;  %v3763_v35 = vld [vmem:[%s4175_s3 + $0x64] ss:$16 sps:$4 sm:$0xff]  }
 0x43b   :  { %2969 = vtanh.f32 %v1352_v8 }
 0x43e   :  { %v2956_v29 = vpop.eup %2955 }
 0x43f   :  { %v2958_v26 = vpop.eup %2957  ;;  %v1337_v31 = vadd.f32 1.0, %v2956_v29  ;;  %v3745_v29 = vld [vmem:[%s4175_s3 + $0x4c] ss:$16 sps:$4 sm:$0xff]  }
 0x440   :  { %v1345_v61 = vadd.f32 1.0, %v2958_v26  ;;  %v2960_v9 = vpop.eup %2959  ;;  %v3751_v26 = vld [vmem:[%s4175_s3 + $0x40] ss:$16 sps:$4 sm:$0xff]  }
 0x441   :  { %v1339_v30 = vmul.f32 0.5, %v1337_v31  ;;  %v2962_v11 = vpop.eup %2961  ;;  %v1338_v32 = vadd.f32 1.0, %v2960_v9  ;;  %v3757_v31 = vld [vmem:[%s4175_s3 + $0x48] ss:$16 sps:$4 sm:$0xff]  }
 0x442   :  { %v1347_v12 = vmul.f32 0.5, %v1345_v61  ;;  %v2964_v14 = vpop.eup %2963 }
 0x443   :  { %v1361_v16 = vmul.f32 %v2962_v11, %v1339_v30  ;;  %v1340_v19 = vmul.f32 0.5, %v1338_v32  ;;  %v1346_v20 = vadd.f32 1.0, %v2964_v14  ;;  %v2966_v43 = vpop.eup %2965 }
 0x444   :  { %v1359_v18 = vmul.f32 %v1347_v12, %v3641_v52  ;;  %v2968_v40 = vpop.eup %2967 }
 0x445   :  { %v1348_v36 = vmul.f32 0.5, %v1346_v20  ;;  %v1362_v37 = vmul.f32 %v2966_v43, %v1340_v19  ;;  %v2970_v41 = vpop.eup %2969  ;;  %v1355_v42 = vadd.f32 1.0, %v2968_v40 }
 0x446   :  { %v3691_v13 = vadd.f32 %v1361_v16, %v1359_v18  ;;  %v1356_v52 = vadd.f32 1.0, %v2970_v41 }
 0x447   :  { %v1360_v38 = vmul.f32 %v1348_v36, %v3645_v10  ;;  %v1357_v45 = vmul.f32 0.5, %v1355_v42  ;;  %v3701_v10 = vld [vmem:[%s4175_s3] ss:$16 sps:$4 sm:$0xff]  }
 0x448   :  { %2971 = vtanh.f32 %v3691_v13  ;;  %v1358_v46 = vmul.f32 0.5, %v1356_v52 }
 0x449   :  { %v3695_v39 = vadd.f32 %v1362_v37, %v1360_v38 }
 0x44b   :  { %2973 = vtanh.f32 %v3695_v39 }
 0x452   :  { %v2972_v44 = vpop.eup %2971 }
 0x453   :  { %v1367_v7 = vmul.f32 %v2972_v44, %v1357_v45 }
 0x455   :  { %v2974_v47 = vpop.eup %2973 }
 0x456   :  { %v1368_v22 = vmul.f32 %v2974_v47, %v1358_v46 }
 0x458   :  { %v1380_v33 = vpack.c.bf16 %v1368_v22, %v1367_v7 }
 0x45a   :  { %1414 = vmatmul.mubr.bf16.vlgmr.msra.gmra.mrb[16].mxu0 %v1380_v33  ;;  %1457 = vmatmul.mubr.bf16.vlgmr.msra.gmra.mrb[16].mxu1 %v1380_v33 }
 0x45b   :  { %1524 = vmatpush1.bf16.msra.mxu0 %v3701_v10  ;;  %1567 = vmatpush1.bf16.msra.mxu1 %v3707_v34 }
 0x45c   :  { %1525 = vmatprep.subr.bf16.mxu0 %v3713_v25  ;;  %1568 = vmatprep.subr.bf16.mxu1 %v3719_v28 }
 0x45d   :  { %1555 = vmatprep.mubr.bf16.mxu0 %v3087_v1  ;;  %1598 = vmatprep.mubr.bf16.mxu1 %v3087_v1 }
 0x45f   :  { %1526 = vmatpush1.bf16.msra.mxu0 %v3727_v27  ;;  %1569 = vmatpush1.bf16.msra.mxu1 %v3733_v24 }
 0x460   :  { %1527 = vmatprep.subr.bf16.mxu0 %v3739_v23  ;;  %1570 = vmatprep.subr.bf16.mxu1 %v3745_v29 }
 0x463   :  { %1528 = vmatpush1.bf16.msra.mxu0 %v3751_v26  ;;  %1571 = vmatpush1.bf16.msra.mxu1 %v3757_v31 }
 0x464   :  { %1529 = vmatprep.subr.bf16.mxu0 %v3763_v35  ;;  %1572 = vmatprep.subr.bf16.mxu1 %v3338_v48  ;;  %v3788_v48 = vld [vmem:[%s4175_s3 + $0x4] ss:$16 sps:$4 sm:$0xff]  }
 0x467   :  { %1530 = vmatpush1.bf16.msra.mxu0 %v3347_v49  ;;  %1573 = vmatpush1.bf16.msra.mxu1 %v3359_v51  ;;  %v3794_v49 = vld [vmem:[%s4175_s3 + $0xc] ss:$16 sps:$4 sm:$0xff]  }
 0x468   :  { %1531 = vmatprep.subr.bf16.mxu0 %v3352_v50  ;;  %1574 = vmatprep.subr.bf16.mxu1 %v3374_v54 }
 0x46b   :  { %1532 = vmatpush1.bf16.msra.mxu0 %v3368_v53  ;;  %1575 = vmatpush1.bf16.msra.mxu1 %v3386_v56 }
 0x46c   :  { %1533 = vmatprep.subr.bf16.mxu0 %v3381_v55  ;;  %1576 = vmatprep.subr.bf16.mxu1 %v3391_v57 }
 0x46f   :  { %1534 = vmatpush1.bf16.msra.mxu0 %v3400_v58  ;;  %1577 = vmatpush1.bf16.msra.mxu1 %v3412_v60 }
 0x470   :  { %1535 = vmatprep.subr.bf16.mxu0 %v3407_v59  ;;  %1578 = vmatprep.subr.bf16.mxu1 %v3427_v63 }
 0x473   :  { %1536 = vmatpush1.bf16.msra.mxu0 %v3422_v62  ;;  %1579 = vmatpush1.bf16.msra.mxu1 %v3439_v2 }
 0x474   :  { %1537 = vmatprep.subr.bf16.mxu0 %v3434_v0  ;;  %1580 = vmatprep.subr.bf16.mxu1 %v3444_v3 }
 0x477   :  { %1538 = vmatpush1.bf16.msra.mxu0 %v3453_v4  ;;  %1581 = vmatpush1.bf16.msra.mxu1 %v3460_v5 }
 0x478   :  { %1665 = vmatprep.subr.bf16.mxu0 %v3788_v48  ;;  %1708 = vmatprep.subr.bf16.mxu1 %v3794_v49 }
 0x52d   :  { %v1415_v50 = vpop.f32.mrb[16].mxu0  ;;  %v1458_v51 = vpop.f32.mrb[16].mxu1 }
 0x52e   :  { %v2644_v53 = vadd.f32 %v1415_v50, %v3526_v15  ;;  %v1417_v54 = vpop.f32.mrb[17].mxu0  ;;  %v1460_v55 = vpop.f32.mrb[17].mxu1  ;;  %v2676_v3 = vadd.f32 %v1458_v51, %v3531_v21 }
 0x52f   :  { %v2645_v56 = vadd.f32 %v1417_v54, %v3528_v17  ;;  %v1419_v57 = vpop.f32.mrb[18].mxu0  ;;  %v1462_v58 = vpop.f32.mrb[18].mxu1  ;;  %v2677_v8 = vadd.f32 %v1460_v55, %v3537_v6 }
 0x530   :  { %v1475_v59 = vmul.f32 0.5, %v2644_v53  ;;  %v2646_v60 = vadd.f32 %v1419_v57, %v3526_v15  ;;  %v1421_v62 = vpop.f32.mrb[19].mxu0  ;;  %v1464_v63 = vpop.f32.mrb[19].mxu1  ;;  %v2678_v61 = vadd.f32 %v1462_v58, %v3531_v21 }
 0x531   :  { %v1483_v0 = vmul.f32 0.5, %v2645_v56  ;;  %v2647_v2 = vadd.f32 %v1421_v62, %v3528_v17  ;;  %v2679_v9 = vadd.f32 %v1464_v63, %v3537_v6  ;;  %v1493_v32 = vmul.f32 0.5, %v2677_v8  ;;  %v3847_v62 = vld [vmem:[%s4175_s3 + $0x84] ss:$16 sps:$4 sm:$0xff]   ;;  %v3853_v63 = vld [vmem:[%s4175_s3 + $0x8c] ss:$16 sps:$4 sm:$0xff]  }
 0x532   :  { %2975 = vtanh.f32 %v1475_v59  ;;  %v1476_v4 = vmul.f32 0.5, %v2646_v60  ;;  %v3835_v59 = vld [vmem:[%s4175_s3 + $0x60] ss:$16 sps:$4 sm:$0xff]   ;;  %v3841_v60 = vld [vmem:[%s4175_s3 + $0x68] ss:$16 sps:$4 sm:$0xff]  }
 0x533   :  { %2977 = vtanh.f32 %v1483_v0  ;;  %v1484_v5 = vmul.f32 0.5, %v2647_v2  ;;  %v1494_v16 = vmul.f32 0.5, %v2679_v9  ;;  %v3859_v0 = vld [vmem:[%s4175_s3 + $0x80] ss:$16 sps:$4 sm:$0xff]   ;;  %v3865_v2 = vld [vmem:[%s4175_s3 + $0x88] ss:$16 sps:$4 sm:$0xff]  }
 0x534   :  { %2979 = vtanh.f32 %v1476_v4  ;;  %v3877_v4 = vld [vmem:[%s4175_s3 + $0xac] ss:$16 sps:$4 sm:$0xff]   ;;  %v3895_v8 = vld [vmem:[%s4175_s3 + $0xc4] ss:$16 sps:$4 sm:$0xff]  }
 0x535   :  { %2981 = vtanh.f32 %v2676_v3  ;;  %v3871_v3 = vld [vmem:[%s4175_s3 + $0xa4] ss:$16 sps:$4 sm:$0xff]   ;;  %v3901_v9 = vld [vmem:[%s4175_s3 + $0xcc] ss:$16 sps:$4 sm:$0xff]  }
 0x536   :  { %2983 = vtanh.f32 %v1484_v5  ;;  %v3883_v5 = vld [vmem:[%s4175_s3 + $0xa0] ss:$16 sps:$4 sm:$0xff]  }
 0x537   :  { %2985 = vtanh.f32 %v2678_v61  ;;  %v3889_v61 = vld [vmem:[%s4175_s3 + $0xa8] ss:$16 sps:$4 sm:$0xff]  }
 0x538   :  { %2987 = vtanh.f32 %v1493_v32  ;;  %v3925_v32 = vld [vmem:[%s4175_s3 + $0xec] ss:$16 sps:$4 sm:$0xff]  }
 0x539   :  { %2989 = vtanh.f32 %v1494_v16  ;;  %v3937_v16 = vld [vmem:[%s4175_s3 + $0xe8] ss:$16 sps:$4 sm:$0xff]  }
 0x53c   :  { %v2976_v30 = vpop.eup %2975 }
 0x53d   :  { %v2978_v11 = vpop.eup %2977  ;;  %v1479_v12 = vadd.f32 1.0, %v2976_v30  ;;  %v3907_v30 = vld [vmem:[%s4175_s3 + $0xc0] ss:$16 sps:$4 sm:$0xff]  }
 0x53e   :  { %v1487_v14 = vadd.f32 1.0, %v2978_v11  ;;  %v2980_v18 = vpop.eup %2979  ;;  %v3913_v11 = vld [vmem:[%s4175_s3 + $0xc8] ss:$16 sps:$4 sm:$0xff]  }
 0x53f   :  { %v1481_v19 = vmul.f32 0.5, %v1479_v12  ;;  %v2982_v20 = vpop.eup %2981  ;;  %v1480_v36 = vadd.f32 1.0, %v2980_v18  ;;  %v3919_v12 = vld [vmem:[%s4175_s3 + $0xe4] ss:$16 sps:$4 sm:$0xff]  }
 0x540   :  { %v1489_v43 = vmul.f32 0.5, %v1487_v14  ;;  %v2984_v37 = vpop.eup %2983  ;;  %v3931_v14 = vld [vmem:[%s4175_s3 + $0xe0] ss:$16 sps:$4 sm:$0xff]  }
 0x541   :  { %v1503_v38 = vmul.f32 %v2982_v20, %v1481_v19  ;;  %v1482_v41 = vmul.f32 0.5, %v1480_v36  ;;  %v1488_v42 = vadd.f32 1.0, %v2984_v37  ;;  %v2986_v52 = vpop.eup %2985 }
 0x542   :  { %v1501_v40 = vmul.f32 %v1489_v43, %v3691_v13  ;;  %v2988_v22 = vpop.eup %2987 }
 0x543   :  { %v1490_v45 = vmul.f32 0.5, %v1488_v42  ;;  %v1504_v46 = vmul.f32 %v2986_v52, %v1482_v41  ;;  %v2990_v33 = vpop.eup %2989  ;;  %v1497_v50 = vadd.f32 1.0, %v2988_v22 }
 0x544   :  { %v3806_v44 = vadd.f32 %v1503_v38, %v1501_v40  ;;  %v1498_v13 = vadd.f32 1.0, %v2990_v33 }
 0x545   :  { %v1502_v47 = vmul.f32 %v1490_v45, %v3695_v39  ;;  %v1499_v53 = vmul.f32 0.5, %v1497_v50  ;;  %v3829_v39 = vld [vmem:[%s4175_s3 + $0x6c] ss:$16 sps:$4 sm:$0xff]  }
 0x546   :  { %2991 = vtanh.f32 %v3806_v44  ;;  %v1500_v54 = vmul.f32 0.5, %v1498_v13 }
 0x547   :  { %v3810_v7 = vadd.f32 %v1504_v46, %v1502_v47 }
 0x549   :  { %2993 = vtanh.f32 %v3810_v7 }
 0x550   :  { %v2992_v51 = vpop.eup %2991 }
 0x551   :  { %v1509_v56 = vmul.f32 %v2992_v51, %v1499_v53 }
 0x553   :  { %v2994_v55 = vpop.eup %2993 }
 0x554   :  { %v1510_v57 = vmul.f32 %v2994_v55, %v1500_v54 }
 0x556   :  { %v1522_v58 = vpack.c.bf16 %v1510_v57, %v1509_v56 }
 0x558   :  { %1556 = vmatmul.mubr.bf16.vlgmr.msra.gmra.mrb[20].mxu0 %v1522_v58  ;;  %1599 = vmatmul.mubr.bf16.vlgmr.msra.gmra.mrb[20].mxu1 %v1522_v58 }
 0x559   :  { %1666 = vmatpush1.bf16.msra.mxu0 %v3701_v10  ;;  %1709 = vmatpush1.bf16.msra.mxu1 %v3707_v34 }
 0x55a   :  { %1667 = vmatprep.subr.bf16.mxu0 %v3713_v25  ;;  %1710 = vmatprep.subr.bf16.mxu1 %v3719_v28 }
 0x55b   :  { %1697 = vmatprep.mubr.bf16.mxu0 %v3087_v1  ;;  %1740 = vmatprep.mubr.bf16.mxu1 %v3087_v1 }
 0x55d   :  { %1668 = vmatpush1.bf16.msra.mxu0 %v3727_v27  ;;  %1711 = vmatpush1.bf16.msra.mxu1 %v3733_v24 }
 0x55e   :  { %1669 = vmatprep.subr.bf16.mxu0 %v3739_v23  ;;  %1712 = vmatprep.subr.bf16.mxu1 %v3745_v29 }
 0x561   :  { %1670 = vmatpush1.bf16.msra.mxu0 %v3751_v26  ;;  %1713 = vmatpush1.bf16.msra.mxu1 %v3757_v31 }
 0x562   :  { %1671 = vmatprep.subr.bf16.mxu0 %v3763_v35  ;;  %1714 = vmatprep.subr.bf16.mxu1 %v3829_v39 }
 0x565   :  { %1672 = vmatpush1.bf16.msra.mxu0 %v3835_v59  ;;  %1715 = vmatpush1.bf16.msra.mxu1 %v3841_v60 }
 0x566   :  { %1673 = vmatprep.subr.bf16.mxu0 %v3847_v62  ;;  %1716 = vmatprep.subr.bf16.mxu1 %v3853_v63 }
 0x569   :  { %1674 = vmatpush1.bf16.msra.mxu0 %v3859_v0  ;;  %1717 = vmatpush1.bf16.msra.mxu1 %v3865_v2 }
 0x56a   :  { %1675 = vmatprep.subr.bf16.mxu0 %v3871_v3  ;;  %1718 = vmatprep.subr.bf16.mxu1 %v3877_v4 }
 0x56d   :  { %1676 = vmatpush1.bf16.msra.mxu0 %v3883_v5  ;;  %1719 = vmatpush1.bf16.msra.mxu1 %v3889_v61 }
 0x56e   :  { %1677 = vmatprep.subr.bf16.mxu0 %v3895_v8  ;;  %1720 = vmatprep.subr.bf16.mxu1 %v3901_v9 }
 0x571   :  { %1678 = vmatpush1.bf16.msra.mxu0 %v3907_v30  ;;  %1721 = vmatpush1.bf16.msra.mxu1 %v3913_v11 }
 0x572   :  { %1679 = vmatprep.subr.bf16.mxu0 %v3919_v12  ;;  %1722 = vmatprep.subr.bf16.mxu1 %v3925_v32 }
 0x575   :  { %1680 = vmatpush1.bf16.msra.mxu0 %v3931_v14  ;;  %1723 = vmatpush1.bf16.msra.mxu1 %v3937_v16 }
 0x576   :  { %1807 = vmatprep.subr.bf16.mxu0 %v3788_v48  ;;  %1850 = vmatprep.subr.bf16.mxu1 %v3794_v49 }
 0x62b   :  { %v1557_v18 = vpop.f32.mrb[20].mxu0  ;;  %v1600_v19 = vpop.f32.mrb[20].mxu1 }
 0x62c   :  { %v2648_v20 = vadd.f32 %v1557_v18, %v3526_v15  ;;  %v1559_v43 = vpop.f32.mrb[21].mxu0  ;;  %v1602_v36 = vpop.f32.mrb[21].mxu1  ;;  %v2680_v49 = vadd.f32 %v1600_v19, %v3531_v21 }
 0x62d   :  { %v2649_v37 = vadd.f32 %v1559_v43, %v3528_v17  ;;  %v1561_v38 = vpop.f32.mrb[22].mxu0  ;;  %v1604_v40 = vpop.f32.mrb[22].mxu1  ;;  %v2681_v50 = vadd.f32 %v1602_v36, %v3537_v6 }
 0x62e   :  { %v1617_v41 = vmul.f32 0.5, %v2648_v20  ;;  %v2650_v42 = vadd.f32 %v1561_v38, %v3526_v15  ;;  %v1563_v52 = vpop.f32.mrb[23].mxu0  ;;  %v1606_v45 = vpop.f32.mrb[23].mxu1  ;;  %v2682_v33 = vadd.f32 %v1604_v40, %v3531_v21 }
 0x62f   :  { %v1625_v46 = vmul.f32 0.5, %v2649_v37  ;;  %v2651_v48 = vadd.f32 %v1563_v52, %v3528_v17  ;;  %v2683_v13 = vadd.f32 %v1606_v45, %v3537_v6  ;;  %v1635_v55 = vmul.f32 0.5, %v2681_v50 }
 0x630   :  { %2995 = vtanh.f32 %v1617_v41  ;;  %v1618_v47 = vmul.f32 0.5, %v2650_v42 }
 0x631   :  { %2997 = vtanh.f32 %v1625_v46  ;;  %v1626_v22 = vmul.f32 0.5, %v2651_v48  ;;  %v1636_v57 = vmul.f32 0.5, %v2683_v13 }
 0x632   :  { %2999 = vtanh.f32 %v1618_v47 }
 0x633   :  { %3001 = vtanh.f32 %v2680_v49 }
 0x634   :  { %3003 = vtanh.f32 %v1626_v22 }
 0x635   :  { %3005 = vtanh.f32 %v2682_v33 }
 0x636   :  { %3007 = vtanh.f32 %v1635_v55 }
 0x637   :  { %3009 = vtanh.f32 %v1636_v57 }
 0x63a   :  { %v2996_v51 = vpop.eup %2995 }
 0x63b   :  { %v2998_v53 = vpop.eup %2997  ;;  %v1621_v54 = vadd.f32 1.0, %v2996_v51 }
 0x63c   :  { %v1629_v56 = vadd.f32 1.0, %v2998_v53  ;;  %v3000_v58 = vpop.eup %2999 }
 0x63d   :  { %v1623_v18 = vmul.f32 0.5, %v1621_v54  ;;  %v3002_v19 = vpop.eup %3001  ;;  %v1622_v43 = vadd.f32 1.0, %v3000_v58 }
 0x63e   :  { %v1631_v20 = vmul.f32 0.5, %v1629_v56  ;;  %v3004_v37 = vpop.eup %3003 }
 0x63f   :  { %v1645_v38 = vmul.f32 %v3002_v19, %v1623_v18  ;;  %v1624_v36 = vmul.f32 0.5, %v1622_v43  ;;  %v1630_v41 = vadd.f32 1.0, %v3004_v37  ;;  %v3006_v42 = vpop.eup %3005 }
 0x640   :  { %v1643_v40 = vmul.f32 %v1631_v20, %v3806_v44  ;;  %v3008_v47 = vpop.eup %3007 }
 0x641   :  { %v1632_v45 = vmul.f32 0.5, %v1630_v41  ;;  %v1646_v46 = vmul.f32 %v3006_v42, %v1624_v36  ;;  %v3010_v22 = vpop.eup %3009  ;;  %v1639_v33 = vadd.f32 1.0, %v3008_v47 }
 0x642   :  { %v3951_v52 = vadd.f32 %v1645_v38, %v1643_v40  ;;  %v1640_v44 = vadd.f32 1.0, %v3010_v22 }
 0x643   :  { %v1644_v48 = vmul.f32 %v1632_v45, %v3810_v7  ;;  %v1641_v13 = vmul.f32 0.5, %v1639_v33 }
 0x644   :  { %3011 = vtanh.f32 %v3951_v52  ;;  %v1642_v51 = vmul.f32 0.5, %v1640_v44 }
 0x645   :  { %v3955_v49 = vadd.f32 %v1646_v46, %v1644_v48 }
 0x647   :  { %3013 = vtanh.f32 %v3955_v49 }
 0x64e   :  { %v3012_v50 = vpop.eup %3011 }
 0x64f   :  { %v1651_v54 = vmul.f32 %v3012_v50, %v1641_v13  ;;  %v3088_v13 = vmov 0.0  }
 0x651   :  { %v3014_v53 = vpop.eup %3013 }
 0x652   :  { %v1652_v55 = vmul.f32 %v3014_v53, %v1642_v51  ;;  %v2864_v51 = vld [vmem:[%s4177_s5 + $0x8] sm:$0xff]   ;;  %v2865_v53 = vld [vmem:[%s4177_s5 + $0x10] sm:$0xff]  }
 0x654   :  { %v1664_v56 = vpack.c.bf16 %v1652_v55, %v1651_v54  ;;  %v2866_v54 = vld [vmem:[%s4177_s5 + $0x18] sm:$0xff]   ;;  %v2867_v55 = vld [vmem:[%s4177_s5 + $0x20] sm:$0xff]  }
 0x656   :  { %1698 = vmatmul.mubr.bf16.vlgmr.msra.gmra.mrb[24].mxu0 %v1664_v56  ;;  %1741 = vmatmul.mubr.bf16.vlgmr.msra.gmra.mrb[24].mxu1 %v1664_v56  ;;  %v2868_v56 = vld [vmem:[%s4177_s5 + $0x28] sm:$0xff]  }
 0x657   :  { %1808 = vmatpush1.bf16.msra.mxu0 %v3701_v10  ;;  %1851 = vmatpush1.bf16.msra.mxu1 %v3707_v34 }
 0x658   :  { %1809 = vmatprep.subr.bf16.mxu0 %v3713_v25  ;;  %1852 = vmatprep.subr.bf16.mxu1 %v3719_v28 }
 0x659   :  { %1839 = vmatprep.mubr.bf16.mxu0 %v3087_v1  ;;  %1882 = vmatprep.mubr.bf16.mxu1 %v3087_v1 }
 0x65b   :  { %1810 = vmatpush1.bf16.msra.mxu0 %v3727_v27  ;;  %1853 = vmatpush1.bf16.msra.mxu1 %v3733_v24 }
 0x65c   :  { %1811 = vmatprep.subr.bf16.mxu0 %v3739_v23  ;;  %1854 = vmatprep.subr.bf16.mxu1 %v3745_v29 }
 0x65f   :  { %1812 = vmatpush1.bf16.msra.mxu0 %v3751_v26  ;;  %1855 = vmatpush1.bf16.msra.mxu1 %v3757_v31 }
 0x660   :  { %1813 = vmatprep.subr.bf16.mxu0 %v3763_v35  ;;  %1856 = vmatprep.subr.bf16.mxu1 %v3829_v39 }
 0x663   :  { %1814 = vmatpush1.bf16.msra.mxu0 %v3835_v59  ;;  %1857 = vmatpush1.bf16.msra.mxu1 %v3841_v60 }
 0x664   :  { %1815 = vmatprep.subr.bf16.mxu0 %v3847_v62  ;;  %1858 = vmatprep.subr.bf16.mxu1 %v3853_v63 }
 0x667   :  { %1816 = vmatpush1.bf16.msra.mxu0 %v3859_v0  ;;  %1859 = vmatpush1.bf16.msra.mxu1 %v3865_v2 }
 0x668   :  { %1817 = vmatprep.subr.bf16.mxu0 %v3871_v3  ;;  %1860 = vmatprep.subr.bf16.mxu1 %v3877_v4 }
 0x66b   :  { %1818 = vmatpush1.bf16.msra.mxu0 %v3883_v5  ;;  %1861 = vmatpush1.bf16.msra.mxu1 %v3889_v61 }
 0x66c   :  { %1819 = vmatprep.subr.bf16.mxu0 %v3895_v8  ;;  %1862 = vmatprep.subr.bf16.mxu1 %v3901_v9 }
 0x66f   :  { %1820 = vmatpush1.bf16.msra.mxu0 %v3907_v30  ;;  %1863 = vmatpush1.bf16.msra.mxu1 %v3913_v11 }
 0x670   :  { %1821 = vmatprep.subr.bf16.mxu0 %v3919_v12  ;;  %1864 = vmatprep.subr.bf16.mxu1 %v3925_v32 }
 0x673   :  { %1822 = vmatpush1.bf16.msra.mxu0 %v3931_v14  ;;  %1865 = vmatpush1.bf16.msra.mxu1 %v3937_v16 }
 0x674   :  { %2548 = vmatprep.subr.bf16.mxu0 %v3088_v13  ;;  %2568 = vmatprep.subr.bf16.mxu1 %v3088_v13 }
 0x729   :  { %v1699_v1 = vpop.f32.mrb[24].mxu0  ;;  %v1742_v10 = vpop.f32.mrb[24].mxu1 }
 0x72a   :  { %v2652_v34 = vadd.f32 %v1699_v1, %v3526_v15  ;;  %v1701_v25 = vpop.f32.mrb[25].mxu0  ;;  %v1744_v28 = vpop.f32.mrb[25].mxu1  ;;  %v2684_v59 = vadd.f32 %v1742_v10, %v3531_v21  ;;  %v2869_v1 = vld [vmem:[%s4177_s5 + $0x30] sm:$0xff]   ;;  %v2870_v10 = vld [vmem:[%s4177_s5 + $0x38] sm:$0xff]  }
 0x72b   :  { %v2653_v27 = vadd.f32 %v1701_v25, %v3528_v17  ;;  %v1703_v24 = vpop.f32.mrb[26].mxu0  ;;  %v1746_v23 = vpop.f32.mrb[26].mxu1  ;;  %v2685_v0 = vadd.f32 %v1744_v28, %v3537_v6  ;;  %v2872_v25 = vld [vmem:[%s4178_s6 + $0x8] sm:$0xff]   ;;  %v2873_v28 = vld [vmem:[%s4178_s6 + $0x10] sm:$0xff]  }
 0x72c   :  { %v1759_v29 = vmul.f32 0.5, %v2652_v34  ;;  %v2654_v26 = vadd.f32 %v1703_v24, %v3526_v15  ;;  %v1705_v31 = vpop.f32.mrb[27].mxu0  ;;  %v1748_v35 = vpop.f32.mrb[27].mxu1  ;;  %v2686_v63 = vadd.f32 %v1746_v23, %v3531_v21  ;;  %v2871_v34 = vld [vmem:[%s4178_s6] sm:$0xff]   ;;  %v2876_v23 = vld [vmem:[%s4178_s6 + $0x28] sm:$0xff]  }
 0x72d   :  { %v1767_v7 = vmul.f32 0.5, %v2653_v27  ;;  %v2655_v39 = vadd.f32 %v1705_v31, %v3528_v17  ;;  %v2687_v2 = vadd.f32 %v1748_v35, %v3537_v6  ;;  %v1777_v61 = vmul.f32 0.5, %v2685_v0  ;;  %v2874_v27 = vld [vmem:[%s4178_s6 + $0x18] sm:$0xff]   ;;  %v2875_v24 = vld [vmem:[%s4178_s6 + $0x20] sm:$0xff]  }
 0x72e   :  { %3015 = vtanh.f32 %v1759_v29  ;;  %v1760_v60 = vmul.f32 0.5, %v2654_v26 }
 0x72f   :  { %3017 = vtanh.f32 %v1767_v7  ;;  %v1768_v62 = vmul.f32 0.5, %v2655_v39  ;;  %v1778_v9 = vmul.f32 0.5, %v2687_v2 }
 0x730   :  { %3019 = vtanh.f32 %v1760_v60 }
 0x731   :  { %3021 = vtanh.f32 %v2684_v59 }
 0x732   :  { %3023 = vtanh.f32 %v1768_v62 }
 0x733   :  { %3025 = vtanh.f32 %v2686_v63 }
 0x734   :  { %3027 = vtanh.f32 %v1777_v61 }
 0x735   :  { %3029 = vtanh.f32 %v1778_v9 }
 0x738   :  { %v3016_v3 = vpop.eup %3015 }
 0x739   :  { %v3018_v4 = vpop.eup %3017  ;;  %v1763_v5 = vadd.f32 1.0, %v3016_v3 }
 0x73a   :  { %v1771_v8 = vadd.f32 1.0, %v3018_v4  ;;  %v3020_v30 = vpop.eup %3019 }
 0x73b   :  { %v1765_v11 = vmul.f32 0.5, %v1763_v5  ;;  %v3022_v12 = vpop.eup %3021  ;;  %v1764_v14 = vadd.f32 1.0, %v3020_v30 }
 0x73c   :  { %v1773_v32 = vmul.f32 0.5, %v1771_v8  ;;  %v3024_v16 = vpop.eup %3023 }
 0x73d   :  { %v1787_v57 = vmul.f32 %v3022_v12, %v1765_v11  ;;  %v1766_v18 = vmul.f32 0.5, %v1764_v14  ;;  %v1772_v19 = vadd.f32 1.0, %v3024_v16  ;;  %v3026_v20 = vpop.eup %3025 }
 0x73e   :  { %v1785_v58 = vmul.f32 %v1773_v32, %v3951_v52  ;;  %v3028_v41 = vpop.eup %3027 }
 0x73f   :  { %v1774_v37 = vmul.f32 0.5, %v1772_v19  ;;  %v1788_v38 = vmul.f32 %v3026_v20, %v1766_v18  ;;  %v3030_v42 = vpop.eup %3029  ;;  %v1781_v45 = vadd.f32 1.0, %v3028_v41 }
 0x740   :  { %v3999_v43 = vadd.f32 %v1787_v57, %v1785_v58  ;;  %v1782_v52 = vadd.f32 1.0, %v3030_v42 }
 0x741   :  { %v1786_v40 = vmul.f32 %v1774_v37, %v3955_v49  ;;  %v1783_v48 = vmul.f32 0.5, %v1781_v45  ;;  %v2863_v49 = vld [vmem:[%s4177_s5] sm:$0xff]  }
 0x742   :  { %3031 = vtanh.f32 %v3999_v43  ;;  %v1784_v47 = vmul.f32 0.5, %v1782_v52 }
 0x743   :  { %v4003_v36 = vadd.f32 %v1788_v38, %v1786_v40 }
 0x745   :  { %3033 = vtanh.f32 %v4003_v36 }
 0x74c   :  { %v3032_v46 = vpop.eup %3031 }
 0x74d   :  { %v1793_v33 = vmul.f32 %v3032_v46, %v1783_v48 }
 0x74f   :  { %v3034_v22 = vpop.eup %3033 }
 0x750   :  { %v1794_v44 = vmul.f32 %v3034_v22, %v1784_v47 }
 0x752   :  { %v1806_v50 = vpack.c.bf16 %v1794_v44, %v1793_v33 }
 0x754   :  { %1840 = vmatmul.mubr.bf16.vlgmr.msra.gmra.mrb[28].mxu0 %v1806_v50  ;;  %1883 = vmatmul.mubr.bf16.vlgmr.msra.gmra.mrb[28].mxu1 %v1806_v50 }
 0x755   :  { %2549 = vmatpush3.bf16.msra.mxu0 %v2863_v49  ;;  %2564 = vmatprep.mubr.msk.bf16.mxu0 %vm3089_vm0, %v3088_v13 }
 0x756   :  { %2550 = vmatprep.subr.bf16.mxu0 %v3088_v13  ;;  %2584 = vmatprep.mubr.msk.bf16.mxu1 %vm3089_vm0, %v3088_v13 }
 0x757   :  { %2569 = vmatpush3.bf16.msra.mxu1 %v2871_v34  ;;  %v2881_v34 = vld [vmem:[%s4179_s8 + $0x10] sm:$0xff]  }
 0x758   :  { %2570 = vmatprep.subr.bf16.mxu1 %v3088_v13 }
 0x759   :  { %2551 = vmatpush3.bf16.msra.mxu0 %v2864_v51 }
 0x75a   :  { %2552 = vmatprep.subr.bf16.mxu0 %v3088_v13 }
 0x75b   :  { %2571 = vmatpush3.bf16.msra.mxu1 %v2872_v25  ;;  %v2882_v25 = vld [vmem:[%s4179_s8 + $0x18] sm:$0xff]  }
 0x75c   :  { %2572 = vmatprep.subr.bf16.mxu1 %v3088_v13 }
 0x75d   :  { %2553 = vmatpush3.bf16.msra.mxu0 %v2865_v53 }
 0x75e   :  { %2554 = vmatprep.subr.bf16.mxu0 %v3088_v13 }
 0x75f   :  { %2573 = vmatpush3.bf16.msra.mxu1 %v2873_v28  ;;  %v2883_v28 = vld [vmem:[%s4179_s8 + $0x20] sm:$0xff]  }
 0x760   :  { %2574 = vmatprep.subr.bf16.mxu1 %v3088_v13 }
 0x761   :  { %2555 = vmatpush3.bf16.msra.mxu0 %v2866_v54 }
 0x762   :  { %2556 = vmatprep.subr.bf16.mxu0 %v3088_v13 }
 0x763   :  { %2575 = vmatpush3.bf16.msra.mxu1 %v2874_v27  ;;  %v2884_v27 = vld [vmem:[%s4179_s8 + $0x28] sm:$0xff]  }
 0x764   :  { %2576 = vmatprep.subr.bf16.mxu1 %v3088_v13 }
 0x765   :  { %2557 = vmatpush3.bf16.msra.mxu0 %v2867_v55 }
 0x766   :  { %2558 = vmatprep.subr.bf16.mxu0 %v3088_v13 }
 0x767   :  { %2577 = vmatpush3.bf16.msra.mxu1 %v2875_v24  ;;  %v1937_v24 = vld [vmem:[%s4180_s1] sm:$0xff] }
 0x768   :  { %2578 = vmatprep.subr.bf16.mxu1 %v3088_v13 }
 0x769   :  { %2559 = vmatpush3.bf16.msra.mxu0 %v2868_v56  ;;  %v2878_v56 = vld [vmem:[%s4178_s6 + $0x38] sm:$0xff]  }
 0x76a   :  { %2560 = vmatprep.subr.bf16.mxu0 %v3088_v13 }
 0x76b   :  { %2579 = vmatpush3.bf16.msra.mxu1 %v2876_v23 }
 0x76c   :  { %2580 = vmatprep.subr.bf16.mxu1 %v3088_v13 }
 0x76d   :  { %2561 = vmatpush3.bf16.msra.mxu0 %v2869_v1  ;;  %v2879_v1 = vld [vmem:[%s4179_s8] sm:$0xff]  }
 0x76e   :  { %2562 = vmatprep.subr.bf16.mxu0 %v3088_v13 }
 0x771   :  { %2563 = vmatpush3.bf16.msra.mxu0 %v2870_v10  ;;  %v2880_v10 = vld [vmem:[%s4179_s8 + $0x8] sm:$0xff]  }
 0x772   :  { %2588 = vmatprep.subr.bf16.mxu0 %v3088_v13 }
 0x827   :  { %v1841_v29 = vpop.f32.mrb[28].mxu0  ;;  %v1884_v26 = vpop.f32.mrb[28].mxu1 }
 0x828   :  { %v2656_v31 = vadd.f32 %v1841_v29, %v3526_v15  ;;  %v1843_v35 = vpop.f32.mrb[29].mxu0  ;;  %v1886_v7 = vpop.f32.mrb[29].mxu1  ;;  %v2688_v5 = vadd.f32 %v1884_v26, %v3531_v21  ;;  %v1938_v29 = vld [vmem:[%s4180_s1 + $0x8] sm:$0xff] }
 0x829   :  { %v2657_v39 = vadd.f32 %v1843_v35, %v3528_v17  ;;  %v1845_v59 = vpop.f32.mrb[30].mxu0  ;;  %v1888_v60 = vpop.f32.mrb[30].mxu1  ;;  %v2689_v30 = vadd.f32 %v1886_v7, %v3537_v6 }
 0x82a   :  { %v1901_v62 = vmul.f32 0.5, %v2656_v31  ;;  %v2658_v63 = vadd.f32 %v1845_v59, %v3526_v15  ;;  %v1847_v0 = vpop.f32.mrb[31].mxu0  ;;  %v1890_v2 = vpop.f32.mrb[31].mxu1  ;;  %v2690_v9 = vadd.f32 %v1888_v60, %v3531_v21 }
 0x82b   :  { %v1909_v3 = vmul.f32 0.5, %v2657_v39  ;;  %v2659_v4 = vadd.f32 %v1847_v0, %v3528_v17  ;;  %v1919_v15 = vmul.f32 0.5, %v2689_v30  ;;  %v2691_v11 = vadd.f32 %v1890_v2, %v3537_v6  ;;  %v2886_v0 = vld [vmem:[%s4179_s8 + $0x38] sm:$0xff]   ;;  %v2887_v2 = vld [vmem:[%s4181_s10] sm:$0xff]  }
 0x82c   :  { %3035 = vtanh.f32 %v1901_v62  ;;  %v1902_v61 = vmul.f32 0.5, %v2658_v63  ;;  %v2885_v63 = vld [vmem:[%s4179_s8 + $0x30] sm:$0xff]  }
 0x82d   :  { %3037 = vtanh.f32 %v1909_v3  ;;  %v1910_v8 = vmul.f32 0.5, %v2659_v4  ;;  %v1920_v16 = vmul.f32 0.5, %v2691_v11  ;;  %v2888_v3 = vld [vmem:[%s4181_s10 + $0x8] sm:$0xff]   ;;  %v2889_v4 = vld [vmem:[%s4181_s10 + $0x10] sm:$0xff]  }
 0x82e   :  { %3039 = vtanh.f32 %v1902_v61  ;;  %v2891_v61 = vld [vmem:[%s4181_s10 + $0x20] sm:$0xff]  }
 0x82f   :  { %3041 = vtanh.f32 %v2688_v5  ;;  %v2890_v5 = vld [vmem:[%s4181_s10 + $0x18] sm:$0xff]  }
 0x830   :  { %3043 = vtanh.f32 %v1910_v8  ;;  %v2892_v8 = vld [vmem:[%s4181_s10 + $0x28] sm:$0xff]  }
 0x831   :  { %3045 = vtanh.f32 %v2690_v9  ;;  %v2485_v9 = vld [vmem:[%s4182_s7] ss:$0 sm:$0xff] }
 0x832   :  { %3047 = vtanh.f32 %v1919_v15 }
 0x833   :  { %3049 = vtanh.f32 %v1920_v16 }
 0x836   :  { %v3036_v12 = vpop.eup %3035 }
 0x837   :  { %v3038_v32 = vpop.eup %3037  ;;  %v1905_v17 = vadd.f32 1.0, %v3036_v12 }
 0x838   :  { %v1913_v14 = vadd.f32 1.0, %v3038_v32  ;;  %v3040_v57 = vpop.eup %3039 }
 0x839   :  { %v1907_v58 = vmul.f32 0.5, %v1905_v17  ;;  %v3042_v18 = vpop.eup %3041  ;;  %v1906_v20 = vadd.f32 1.0, %v3040_v57 }
 0x83a   :  { %v1915_v19 = vmul.f32 0.5, %v1913_v14  ;;  %v3044_v21 = vpop.eup %3043 }
 0x83b   :  { %v1929_v37 = vmul.f32 %v3042_v18, %v1907_v58  ;;  %v1908_v40 = vmul.f32 0.5, %v1906_v20  ;;  %v1914_v41 = vadd.f32 1.0, %v3044_v21  ;;  %v3046_v42 = vpop.eup %3045  ;;  %v2893_v58 = vld [vmem:[%s4181_s10 + $0x30] sm:$0xff]   ;;  %v2894_v18 = vld [vmem:[%s4181_s10 + $0x38] sm:$0xff]  }
 0x83c   :  { %v1927_v38 = vmul.f32 %v1915_v19, %v3999_v43  ;;  %v3048_v48 = vpop.eup %3047  ;;  %v2494_v19 = vld [vmem:[%s4183_s9] ss:$0 sm:$0xff] }
 0x83d   :  { %v1916_v45 = vmul.f32 0.5, %v1914_v41  ;;  %v1930_v52 = vmul.f32 %v3046_v42, %v1908_v40  ;;  %v1923_v22 = vadd.f32 1.0, %v3048_v48  ;;  %v3050_v33 = vpop.eup %3049 }
 0x83e   :  { %v1931_v6 = vadd.f32 %v1929_v37, %v1927_v38  ;;  %v1924_v50 = vadd.f32 1.0, %v3050_v33 }
 0x83f   :  { %v1928_v46 = vmul.f32 %v1916_v45, %v4003_v36  ;;  %v1925_v44 = vmul.f32 0.5, %v1923_v22  ;;  %v2877_v36 = vld [vmem:[%s4178_s6 + $0x30] sm:$0xff]  }
 0x840   :  { %3051 = vtanh.f32 %v1931_v6  ;;  %v1926_v43 = vmul.f32 0.5, %v1924_v50  ;;  %2581 = vmatpush3.bf16.msra.mxu1 %v2877_v36 }
 0x841   :  { %v1932_v47 = vadd.f32 %v1930_v52, %v1928_v46  ;;  %2582 = vmatprep.subr.bf16.mxu1 %v3088_v13 }
 0x843   :  { %3053 = vtanh.f32 %v1932_v47 }
 0x844   :  { %2583 = vmatpush3.bf16.msra.mxu1 %v2878_v56 }
 0x845   :  { %2608 = vmatprep.subr.bf16.mxu1 %v3088_v13 }
 0x84a   :  { %v3052_v49 = vpop.eup %3051 }
 0x84b   :  { %v1935_v51 = vmul.f32 %v3052_v49, %v1925_v44 }
 0x84d   :  { %v3054_v53 = vpop.eup %3053 }
 0x84e   :  { %v1936_v54 = vmul.f32 %v3054_v53, %v1926_v43 }
 0x850   :  { %v1939_v55 = vpack.c.bf16 %v1936_v54, %v1935_v51 }
 0x852   :  { %2565 = vmatmul.mubr.bf16.vlgmr.msra.gmra.mrb[32].mxu0 %v1939_v55 }
 0x853   :  { %2604 = vmatprep.mubr.msk.bf16.mxu0 %vm3089_vm0, %v3088_v13  ;;  %2589 = vmatpush3.bf16.msra.mxu0 %v2879_v1 }
 0x854   :  { %2590 = vmatprep.subr.bf16.mxu0 %v3088_v13 }
 0x857   :  { %2591 = vmatpush3.bf16.msra.mxu0 %v2880_v10 }
 0x858   :  { %2592 = vmatprep.subr.bf16.mxu0 %v3088_v13 }
 0x85b   :  { %2593 = vmatpush3.bf16.msra.mxu0 %v2881_v34 }
 0x85c   :  { %2594 = vmatprep.subr.bf16.mxu0 %v3088_v13 }
 0x85f   :  { %2595 = vmatpush3.bf16.msra.mxu0 %v2882_v25 }
 0x860   :  { %2596 = vmatprep.subr.bf16.mxu0 %v3088_v13 }
 0x863   :  { %2597 = vmatpush3.bf16.msra.mxu0 %v2883_v28 }
 0x864   :  { %2598 = vmatprep.subr.bf16.mxu0 %v3088_v13 }
 0x867   :  { %2599 = vmatpush3.bf16.msra.mxu0 %v2884_v27 }
 0x868   :  { %2600 = vmatprep.subr.bf16.mxu0 %v3088_v13 }
 0x86b   :  { %2601 = vmatpush3.bf16.msra.mxu0 %v2885_v63 }
 0x86c   :  { %2602 = vmatprep.subr.bf16.mxu0 %v3088_v13 }
 0x86f   :  { %2603 = vmatpush3.bf16.msra.mxu0 %v2886_v0 }
 0x925   :  { %v2038_v23 = vpop.f32.mrb[32].mxu0 }
 0x926   :  { %v2045_v26 = vadd.f32 %v2038_v23, %v1937_v24  ;;  %v2566_v31 = vpop.f32.mrb[33].mxu0 }
 0x927   :  { %v2041_v35 = vpop.f32.mrb[34].mxu0 }
 0x928   :  { %v2046_v7 = vadd.f32 %v2041_v35, %v1938_v29  ;;  %v2567_v39 = vpop.f32.mrb[35].mxu0  ;;  %v2047_v59 = vmax.f32 %v2045_v26, 0.0 }
 0x92a   :  { %v2048_v60 = vmax.f32 %v2046_v7, 0.0 }
 0x92c   :  { %v2066_v62 = vpack.c.bf16 %v2048_v60, %v2047_v59 }
 0x92e   :  { %2585 = vmatmul.mubr.bf16.vlgmr.msra.gmra.mrb[32].mxu1 %v2066_v62 }
 0x92f   :  { %2624 = vmatprep.mubr.msk.bf16.mxu1 %vm3089_vm0, %v3088_v13  ;;  %2609 = vmatpush3.bf16.msra.mxu1 %v2887_v2 }
 0x930   :  { %2610 = vmatprep.subr.bf16.mxu1 %v3088_v13 }
 0x933   :  { %2611 = vmatpush3.bf16.msra.mxu1 %v2888_v3 }
 0x934   :  { %2612 = vmatprep.subr.bf16.mxu1 %v3088_v13 }
 0x937   :  { %2613 = vmatpush3.bf16.msra.mxu1 %v2889_v4 }
 0x938   :  { %2614 = vmatprep.subr.bf16.mxu1 %v3088_v13 }
 0x93b   :  { %2615 = vmatpush3.bf16.msra.mxu1 %v2890_v5 }
 0x93c   :  { %2616 = vmatprep.subr.bf16.mxu1 %v3088_v13 }
 0x93f   :  { %2617 = vmatpush3.bf16.msra.mxu1 %v2891_v61 }
 0x940   :  { %2618 = vmatprep.subr.bf16.mxu1 %v3088_v13 }
 0x943   :  { %2619 = vmatpush3.bf16.msra.mxu1 %v2892_v8 }
 0x944   :  { %2620 = vmatprep.subr.bf16.mxu1 %v3088_v13 }
 0x947   :  { %2621 = vmatpush3.bf16.msra.mxu1 %v2893_v58 }
 0x948   :  { %2622 = vmatprep.subr.bf16.mxu1 %v3088_v13  ;;  %v2503_v13 = vld [vmem:[%s4184_s11] ss:$0 sm:$0xff] }
 0x94b   :  { %2623 = vmatpush3.bf16.msra.mxu1 %v2894_v18 }
 0xa01   :  { %v2155_v30 = vpop.f32.mrb[32].mxu1 }
 0xa02   :  { %v2156_v15 = vadd.f32 %v2485_v9, %v2155_v30  ;;  %v2586_v11 = vpop.f32.mrb[33].mxu1 }
 0xa03   :  { %v2158_v12 = vpop.f32.mrb[34].mxu1 }
 0xa04   :  { %v2159_v32 = vadd.f32 %v2485_v9, %v2158_v12  ;;  %v2587_v17 = vpop.f32.mrb[35].mxu1  ;;  %v2162_v14 = vmax.f32 %v2156_v15, 0.0 }
 0xa06   :  { %v2163_v16 = vmax.f32 %v2159_v32, 0.0 }
 0xa08   :  { %v2181_v57 = vpack.c.bf16 %v2163_v16, %v2162_v14 }
 0xa0a   :  { %2605 = vmatmul.mubr.bf16.vlgmr.msra.gmra.mrb[36].mxu0 %v2181_v57 }
 0xadd   :  { %v2270_v20 = vpop.f32.mrb[36].mxu0 }
 0xade   :  { %v2271_v21 = vadd.f32 %v2494_v19, %v2270_v20  ;;  %v2606_v37 = vpop.f32.mrb[37].mxu0 }
 0xadf   :  { %v2273_v38 = vpop.f32.mrb[38].mxu0 }
 0xae0   :  { %v2274_v40 = vadd.f32 %v2494_v19, %v2273_v38  ;;  %v2607_v41 = vpop.f32.mrb[39].mxu0  ;;  %v2277_v42 = vmax.f32 %v2271_v21, 0.0 }
 0xae2   :  { %v2278_v6 = vmax.f32 %v2274_v40, 0.0 }
 0xae4   :  { %v2279_v45 = vpack.c.bf16 %v2278_v6, %v2277_v42 }
 0xae6   :  { %2625 = vmatmul.mubr.bf16.vlgmr.msra.gmra.mrb[36].mxu1 %v2279_v45 }
 0xbb9   :  { %v2385_v52 = vpop.f32.mrb[36].mxu1 }
 0xbba   :  { %v2386_v46 = vadd.f32 %v2503_v13, %v2385_v52  ;;  %v2626_v48 = vpop.f32.mrb[37].mxu1 }
 0xbbb   :  { %v2388_v47 = vpop.f32.mrb[38].mxu1 }
 0xbbc   :  { %2392 = vst [vmem:[%s4185_s12] sm:$0xff] %v2386_v46  ;;  %v2389_v22 = vadd.f32 %v2503_v13, %v2388_v47  ;;  %v2627_v33 = vpop.f32.mrb[39].mxu1 }
 0xbbe   :  { %2393 = vst [vmem:[%s4185_s12 + $0x8] sm:$0xff] %v2389_v22 }

</bundles_post_ra>
